<compile_context>
chip_gen: v6e
topology: v6e:2x2x1
jax: 0.10.0
libtpu: 0.0.40
codegen_flags: <defaults>
</compile_context>

<pallas_src>
import math

import jax
import jax.numpy as jnp
from jax.experimental import pallas as pl
from jax.experimental.pallas import tpu as pltpu


def _conv_svhn_fused_kernel(x_ref, w1_ref, b1_ref, w2_ref, b2_ref, o_ref,
                            conv1_ref, pad_ref, conv2_ref):
    """Fused (conv3x3 'same' + ReLU + maxpool2x2) x 2 for a block of B images.

    x_ref:     (B, H+2, W, 3*C0)   kw-expanded, H-padded input block
                                   (last dim index = kw*C0 + cin)
    w1_ref:    (9*C0, C1)          im2col layer-1 weights ((kh,kw,cin) major)
    b1_ref:    (1, C1)
    w2_ref:    (9*C1, C2)          im2col layer-2 weights, C2 lane-padded to 128
    b2_ref:    (1, C2)
    o_ref:     (B, H//4, W//4, C2)
    conv1_ref: (B, H, W, C1)           scratch: layer-1 conv+ReLU
    pad_ref:   (B, H//2+2, W//2+2, C1) scratch: zero-padded layer-2 input
    conv2_ref: (B, H//2, W//2, C2)     scratch: layer-2 conv+ReLU
    """
    B, Hp, W1, KC0 = x_ref.shape          # KC0 = 3 * C0 (kw packed on lanes)
    H1 = Hp - 2
    C1 = w1_ref.shape[1]
    C2 = w2_ref.shape[1]
    Ho1, Wo1 = H1 // 2, W1 // 2
    Ho2, Wo2 = Ho1 // 2, Wo1 // 2
    M1 = B * H1 * W1
    M2 = B * Ho1 * Wo1

    # -------- layer 1: one im2col matmul (K = 9*C0), kh taps only --------
    taps = [x_ref[:, pl.ds(kh, H1), :, :].reshape(M1, KC0) for kh in range(3)]
    patches = jnp.concatenate(taps, axis=-1)                 # (M1, 9*C0)
    y1 = jnp.dot(patches, w1_ref[...], preferred_element_type=jnp.float32)
    y1 = jnp.maximum(y1 + b1_ref[...], 0.0)                  # bias + ReLU

    # -------- layer 1: 2x2 / stride-2 max pool --------
    conv1_ref[...] = y1.reshape(B, H1, W1, C1)
    wmax = jnp.maximum(conv1_ref[:, :, pl.ds(0, Wo1, 2), :],
                       conv1_ref[:, :, pl.ds(1, Wo1, 2), :])  # (B,H1,Wo1,C1)
    wmax = wmax.reshape(B, Ho1, 2, Wo1, C1)                   # leading-dim split
    pooled1 = jnp.maximum(wmax[:, :, 0], wmax[:, :, 1])       # (B,Ho1,Wo1,C1)

    # -------- layer 2 input: 'same' padding kept in VMEM --------
    pad_ref[...] = jnp.zeros_like(pad_ref)
    pad_ref[:, pl.ds(1, Ho1), pl.ds(1, Wo1), :] = pooled1

    # -------- layer 2: one im2col matmul (K = 9*C1) --------
    taps2 = []
    for kh in range(3):
        for kw in range(3):
            p = pad_ref[:, pl.ds(kh, Ho1), pl.ds(kw, Wo1), :]  # (B,Ho1,Wo1,C1)
            taps2.append(p.reshape(M2, C1))
    patches2 = jnp.concatenate(taps2, axis=-1)                # (M2, 9*C1)
    y2 = jnp.dot(patches2, w2_ref[...], preferred_element_type=jnp.float32)
    y2 = jnp.maximum(y2 + b2_ref[...], 0.0)                   # (M2, C2)

    # -------- layer 2: 2x2 / stride-2 max pool, lane-dense store --------
    conv2_ref[...] = y2.reshape(B, Ho1, Wo1, C2)
    wmax2 = jnp.maximum(conv2_ref[:, :, pl.ds(0, Wo2, 2), :],
                        conv2_ref[:, :, pl.ds(1, Wo2, 2), :])  # (B,Ho1,Wo2,C2)
    wmax2 = wmax2.reshape(B, Ho2, 2, Wo2, C2)
    o_ref[...] = jnp.maximum(wmax2[:, :, 0], wmax2[:, :, 1]).astype(o_ref.dtype)


def _pick_block_n(n, max_block=8):
    """Largest divisor of n that is <= max_block while keeping >= 2 grid steps
    (so both TensorCores get work under megacore)."""
    for b in range(min(n, max_block), 0, -1):
        if n % b == 0 and n // b >= 2:
            return b
    return n  # n == 1


def conv_svhn_forward(x_nchw, params, *, block_n=None):
    """Matches ConvSVHN.forward: NCHW in, NCHW out (N, 64, H//4, W//4)."""
    N, C0, H, W = x_nchw.shape
    assert H % 4 == 0 and W % 4 == 0, "kernel assumes H, W divisible by 4"
    assert params["w1"].shape[2] == C0
    C1 = params["w1"].shape[-1]                    # 32
    C2 = params["w2"].shape[-1]                    # 64
    C2p = ((C2 + 127) // 128) * 128                # lane-dense output channels
    Ho, Wo = H // 4, W // 4
    if block_n is None:
        block_n = _pick_block_n(N)
    assert N % block_n == 0

    # NCHW -> NHWC, spatial 'same' padding for the first conv, then pack the
    # kw taps onto the lane axis: xkw[n, h, w, kw*C0 + c] = xpad[n, h, w+kw, c].
    x = jnp.transpose(x_nchw, (0, 2, 3, 1))
    xp = jnp.pad(x, ((0, 0), (1, 1), (1, 1), (0, 0)))        # (N, H+2, W+2, C0)
    xkw = jnp.concatenate([xp[:, :, kw:kw + W, :] for kw in range(3)], axis=-1)

    # im2col weight layout: (kh, kw, cin) flattened into the K dimension.
    w1 = params["w1"].reshape(9 * C0, C1)
    b1 = params["b1"].reshape(1, C1)
    w2 = params["w2"].reshape(9 * C1, C2)
    w2 = jnp.pad(w2, ((0, 0), (0, C2p - C2)))       # zero-pad N side to 128 lanes
    b2 = jnp.pad(params["b2"], (0, C2p - C2)).reshape(1, C2p)

    out = pl.pallas_call(
        _conv_svhn_fused_kernel,
        out_shape=jax.ShapeDtypeStruct((N, Ho, Wo, C2p), x.dtype),
        grid=(N // block_n,),
        in_specs=[
            pl.BlockSpec((block_n, H + 2, W, 3 * C0), lambda n: (n, 0, 0, 0)),
            pl.BlockSpec((9 * C0, C1), lambda n: (0, 0)),
            pl.BlockSpec((1, C1), lambda n: (0, 0)),
            pl.BlockSpec((9 * C1, C2p), lambda n: (0, 0)),
            pl.BlockSpec((1, C2p), lambda n: (0, 0)),
        ],
        out_specs=pl.BlockSpec((block_n, Ho, Wo, C2p), lambda n: (n, 0, 0, 0)),
        scratch_shapes=[
            pltpu.VMEM((block_n, H, W, C1), jnp.float32),
            pltpu.VMEM((block_n, H // 2 + 2, W // 2 + 2, C1), jnp.float32),
            pltpu.VMEM((block_n, H // 2, W // 2, C2p), jnp.float32),
        ],
        compiler_params=pltpu.CompilerParams(
            dimension_semantics=("parallel",)),
    )(xkw, w1, b1, w2, b2)

    # Drop the zero-padded channels, NHWC -> NCHW.
    return jnp.transpose(out[..., :C2], (0, 3, 1, 2))


def init_params(key):
    """Deterministic init mirroring nn.Conv2d defaults (U(-1/sqrt(fan_in), ...))."""
    def conv_init(k, cin, cout):
        kw, kb = jax.random.split(k)
        bound = 1.0 / math.sqrt(cin * 9)
        w = jax.random.uniform(kw, (3, 3, cin, cout), jnp.float32, -bound, bound)
        b = jax.random.uniform(kb, (cout,), jnp.float32, -bound, bound)
        return w, b

    k1, k2 = jax.random.split(key)
    w1, b1 = conv_init(k1, 3, 32)
    w2, b2 = conv_init(k2, 32, 64)
    return {"w1": w1, "b1": b1, "w2": w2, "b2": b2}


def _reference_forward(x_nchw, params):
    """Plain-JAX reference for correctness checking."""
    def layer(x, w, b):
        y = jax.lax.conv_general_dilated(
            x, w, window_strides=(1, 1), padding="SAME",
            dimension_numbers=("NHWC", "HWIO", "NHWC"))
        y = jax.nn.relu(y + b[None, None, None, :])
        return jax.lax.reduce_window(
            y, -jnp.inf, jax.lax.max, (1, 2, 2, 1), (1, 2, 2, 1), "VALID")

    x = jnp.transpose(x_nchw, (0, 2, 3, 1))
    x = layer(x, params["w1"], params["b1"])
    x = layer(x, params["w2"], params["b2"])
    return jnp.transpose(x, (0, 3, 1, 2))


if __name__ == "__main__":
    key = jax.random.PRNGKey(0)
    kx, kp = jax.random.split(key)
    # Small shapes consistent with the module: NCHW, 3 input channels.
    x = jax.random.normal(kx, (2, 3, 16, 16), jnp.float32)
    params = init_params(kp)

    out = jax.jit(conv_svhn_forward)(x, params)
    out = jax.block_until_ready(out)

    assert out.shape == (2, 64, 4, 4), out.shape
    ref = _reference_forward(x, params)
    err = float(jnp.max(jnp.abs(out - ref)))
    assert jnp.allclose(out, ref, atol=1e-4, rtol=1e-4), err

    print("KERNEL_OK")
</pallas_src>

<mosaic_0001>
module attributes {stable_mosaic.version = 11 : i64} {
  func.func @_conv_svhn_fused_kernel(%arg0: i32, %arg1: memref<1x18x16x9xf32, #tpu.memory_space<vmem>>, %arg2: memref<27x32xf32, #tpu.memory_space<vmem>>, %arg3: memref<1x32xf32, #tpu.memory_space<vmem>>, %arg4: memref<288x128xf32, #tpu.memory_space<vmem>>, %arg5: memref<1x128xf32, #tpu.memory_space<vmem>>, %arg6: memref<1x4x4x128xf32, #tpu.memory_space<vmem>>, %arg7: memref<1x16x16x32xf32, #tpu.memory_space<vmem>>, %arg8: memref<1x10x10x32xf32, #tpu.memory_space<vmem>>, %arg9: memref<1x8x8x128xf32, #tpu.memory_space<vmem>>) attributes {dimension_semantics = [#tpu.dimension_semantics<parallel>], iteration_bounds = array<i64: 2>, scalar_prefetch = 0 : i64, scratch_operands = 3 : i64, tpu.core_type = #tpu.core_type<tc>, window_params = [{transform_indices = @transform_0, window_bounds = array<i64: 1, 18, 16, 9>}, {pipeline_mode = #tpu.pipeline_mode<synchronous>, transform_indices = @transform_1, window_bounds = array<i64: 27, 32>}, {pipeline_mode = #tpu.pipeline_mode<synchronous>, transform_indices = @transform_2, window_bounds = array<i64: 1, 32>}, {pipeline_mode = #tpu.pipeline_mode<synchronous>, transform_indices = @transform_3, window_bounds = array<i64: 288, 128>}, {pipeline_mode = #tpu.pipeline_mode<synchronous>, transform_indices = @transform_4, window_bounds = array<i64: 1, 128>}, {transform_indices = @transform_5, window_bounds = array<i64: 1, 4, 4, 128>}]} {
    %c0 = arith.constant 0 : index
    %c0_0 = arith.constant 0 : index
    %c0_1 = arith.constant 0 : index
    %c0_2 = arith.constant 0 : index
    %0 = vector.load %arg1[%c0, %c0_0, %c0_1, %c0_2] : memref<1x18x16x9xf32, #tpu.memory_space<vmem>>, vector<1x16x16x9xf32>
    %1 = vector.shape_cast %0 : vector<1x16x16x9xf32> to vector<256x9xf32>
    %c0_3 = arith.constant 0 : index
    %c1 = arith.constant 1 : index
    %c0_4 = arith.constant 0 : index
    %c0_5 = arith.constant 0 : index
    %2 = vector.load %arg1[%c0_3, %c1, %c0_4, %c0_5] : memref<1x18x16x9xf32, #tpu.memory_space<vmem>>, vector<1x16x16x9xf32>
    %3 = vector.shape_cast %2 : vector<1x16x16x9xf32> to vector<256x9xf32>
    %c0_6 = arith.constant 0 : index
    %c2 = arith.constant 2 : index
    %c0_7 = arith.constant 0 : index
    %c0_8 = arith.constant 0 : index
    %4 = vector.load %arg1[%c0_6, %c2, %c0_7, %c0_8] : memref<1x18x16x9xf32, #tpu.memory_space<vmem>>, vector<1x16x16x9xf32>
    %5 = vector.shape_cast %4 : vector<1x16x16x9xf32> to vector<256x9xf32>
    %6 = tpu.concatenate %1, %3, %5 in 1 : vector<256x9xf32>, vector<256x9xf32>, vector<256x9xf32> -> vector<256x27xf32>
    %c0_9 = arith.constant 0 : index
    %c0_10 = arith.constant 0 : index
    %7 = vector.load %arg2[%c0_9, %c0_10] : memref<27x32xf32, #tpu.memory_space<vmem>>, vector<27x32xf32>
    %cst = arith.constant dense<0.000000e+00> : vector<256x32xf32>
    %8 = tpu.matmul %6, %7, %cst {dimension_numbers = #tpu.dot_dimension_numbers<[1], [0], [0], [1], [0, 0, 1, 1], [], []>} : vector<256x27xf32>, vector<27x32xf32>, vector<256x32xf32> -> vector<256x32xf32>
    %c0_11 = arith.constant 0 : index
    %c0_12 = arith.constant 0 : index
    %9 = vector.load %arg3[%c0_11, %c0_12] : memref<1x32xf32, #tpu.memory_space<vmem>>, vector<1x32xf32>
    %10 = vector.broadcast %9 : vector<1x32xf32> to vector<256x32xf32>
    %11 = arith.addf %8, %10 : vector<256x32xf32>
    %cst_13 = arith.constant 0.000000e+00 : f32
    %12 = vector.broadcast %cst_13 : f32 to vector<256x32xf32>
    %13 = arith.maximumf %11, %12 : vector<256x32xf32>
    %14 = vector.shape_cast %13 : vector<256x32xf32> to vector<1x16x16x32xf32>
    %c0_14 = arith.constant 0 : index
    %c0_15 = arith.constant 0 : index
    %c0_16 = arith.constant 0 : index
    %c0_17 = arith.constant 0 : index
    %15 = vector.load %arg7[%c0_14, %c0_15, %c0_16, %c0_17] : memref<1x16x16x32xf32, #tpu.memory_space<vmem>>, vector<1x16x16x32xf32>
    tpu.vector_store %arg7[%c0_14, %c0_15, %c0_16, %c0_17], %14 {strides = array<i32>} : memref<1x16x16x32xf32, #tpu.memory_space<vmem>>, vector<1x16x16x32xf32>,
    %c0_18 = arith.constant 0 : index
    %c0_19 = arith.constant 0 : index
    %c0_20 = arith.constant 0 : index
    %c0_21 = arith.constant 0 : index
    %16 = tpu.strided_load %arg7[%c0_18, %c0_19, %c0_20, %c0_21] {strides = array<i32: 1, 1, 2, 1>} : memref<1x16x16x32xf32, #tpu.memory_space<vmem>>, vector<1x16x8x32xf32>
    %c0_22 = arith.constant 0 : index
    %c0_23 = arith.constant 0 : index
    %c1_24 = arith.constant 1 : index
    %c0_25 = arith.constant 0 : index
    %17 = tpu.strided_load %arg7[%c0_22, %c0_23, %c1_24, %c0_25] {strides = array<i32: 1, 1, 2, 1>} : memref<1x16x16x32xf32, #tpu.memory_space<vmem>>, vector<1x16x8x32xf32>
    %18 = arith.maximumf %16, %17 : vector<1x16x8x32xf32>
    %19 = vector.shape_cast %18 : vector<1x16x8x32xf32> to vector<1x8x2x8x32xf32>
    %20 = vector.extract_strided_slice %19 {offsets = [0, 0, 0, 0, 0], sizes = [1, 8, 1, 8, 32], strides = [1, 1, 1, 1, 1]} : vector<1x8x2x8x32xf32> to vector<1x8x1x8x32xf32>
    %21 = vector.shape_cast %20 : vector<1x8x1x8x32xf32> to vector<1x8x8x32xf32>
    %22 = vector.extract_strided_slice %19 {offsets = [0, 0, 1, 0, 0], sizes = [1, 8, 1, 8, 32], strides = [1, 1, 1, 1, 1]} : vector<1x8x2x8x32xf32> to vector<1x8x1x8x32xf32>
    %23 = vector.shape_cast %22 : vector<1x8x1x8x32xf32> to vector<1x8x8x32xf32>
    %24 = arith.maximumf %21, %23 : vector<1x8x8x32xf32>
    %cst_26 = arith.constant 0.000000e+00 : f32
    %25 = vector.broadcast %cst_26 : f32 to vector<1x10x10x32xf32>
    %c0_27 = arith.constant 0 : index
    %c0_28 = arith.constant 0 : index
    %c0_29 = arith.constant 0 : index
    %c0_30 = arith.constant 0 : index
    %26 = vector.load %arg8[%c0_27, %c0_28, %c0_29, %c0_30] : memref<1x10x10x32xf32, #tpu.memory_space<vmem>>, vector<1x10x10x32xf32>
    tpu.vector_store %arg8[%c0_27, %c0_28, %c0_29, %c0_30], %25 {strides = array<i32>} : memref<1x10x10x32xf32, #tpu.memory_space<vmem>>, vector<1x10x10x32xf32>,
    %c0_31 = arith.constant 0 : index
    %c1_32 = arith.constant 1 : index
    %c1_33 = arith.constant 1 : index
    %c0_34 = arith.constant 0 : index
    %27 = vector.load %arg8[%c0_31, %c1_32, %c1_33, %c0_34] : memref<1x10x10x32xf32, #tpu.memory_space<vmem>>, vector<1x8x8x32xf32>
    tpu.vector_store %arg8[%c0_31, %c1_32, %c1_33, %c0_34], %24 {strides = array<i32>} : memref<1x10x10x32xf32, #tpu.memory_space<vmem>>, vector<1x8x8x32xf32>,
    %c0_35 = arith.constant 0 : index
    %c0_36 = arith.constant 0 : index
    %c0_37 = arith.constant 0 : index
    %c0_38 = arith.constant 0 : index
    %28 = vector.load %arg8[%c0_35, %c0_36, %c0_37, %c0_38] : memref<1x10x10x32xf32, #tpu.memory_space<vmem>>, vector<1x8x8x32xf32>
    %29 = vector.shape_cast %28 : vector<1x8x8x32xf32> to vector<64x32xf32>
    %c0_39 = arith.constant 0 : index
    %c0_40 = arith.constant 0 : index
    %c1_41 = arith.constant 1 : index
    %c0_42 = arith.constant 0 : index
    %30 = vector.load %arg8[%c0_39, %c0_40, %c1_41, %c0_42] : memref<1x10x10x32xf32, #tpu.memory_space<vmem>>, vector<1x8x8x32xf32>
    %31 = vector.shape_cast %30 : vector<1x8x8x32xf32> to vector<64x32xf32>
    %c0_43 = arith.constant 0 : index
    %c0_44 = arith.constant 0 : index
    %c2_45 = arith.constant 2 : index
    %c0_46 = arith.constant 0 : index
    %32 = vector.load %arg8[%c0_43, %c0_44, %c2_45, %c0_46] : memref<1x10x10x32xf32, #tpu.memory_space<vmem>>, vector<1x8x8x32xf32>
    %33 = vector.shape_cast %32 : vector<1x8x8x32xf32> to vector<64x32xf32>
    %c0_47 = arith.constant 0 : index
    %c1_48 = arith.constant 1 : index
    %c0_49 = arith.constant 0 : index
    %c0_50 = arith.constant 0 : index
    %34 = vector.load %arg8[%c0_47, %c1_48, %c0_49, %c0_50] : memref<1x10x10x32xf32, #tpu.memory_space<vmem>>, vector<1x8x8x32xf32>
    %35 = vector.shape_cast %34 : vector<1x8x8x32xf32> to vector<64x32xf32>
    %c0_51 = arith.constant 0 : index
    %c1_52 = arith.constant 1 : index
    %c1_53 = arith.constant 1 : index
    %c0_54 = arith.constant 0 : index
    %36 = vector.load %arg8[%c0_51, %c1_52, %c1_53, %c0_54] : memref<1x10x10x32xf32, #tpu.memory_space<vmem>>, vector<1x8x8x32xf32>
    %37 = vector.shape_cast %36 : vector<1x8x8x32xf32> to vector<64x32xf32>
    %c0_55 = arith.constant 0 : index
    %c1_56 = arith.constant 1 : index
    %c2_57 = arith.constant 2 : index
    %c0_58 = arith.constant 0 : index
    %38 = vector.load %arg8[%c0_55, %c1_56, %c2_57, %c0_58] : memref<1x10x10x32xf32, #tpu.memory_space<vmem>>, vector<1x8x8x32xf32>
    %39 = vector.shape_cast %38 : vector<1x8x8x32xf32> to vector<64x32xf32>
    %c0_59 = arith.constant 0 : index
    %c2_60 = arith.constant 2 : index
    %c0_61 = arith.constant 0 : index
    %c0_62 = arith.constant 0 : index
    %40 = vector.load %arg8[%c0_59, %c2_60, %c0_61, %c0_62] : memref<1x10x10x32xf32, #tpu.memory_space<vmem>>, vector<1x8x8x32xf32>
    %41 = vector.shape_cast %40 : vector<1x8x8x32xf32> to vector<64x32xf32>
    %c0_63 = arith.constant 0 : index
    %c2_64 = arith.constant 2 : index
    %c1_65 = arith.constant 1 : index
    %c0_66 = arith.constant 0 : index
    %42 = vector.load %arg8[%c0_63, %c2_64, %c1_65, %c0_66] : memref<1x10x10x32xf32, #tpu.memory_space<vmem>>, vector<1x8x8x32xf32>
    %43 = vector.shape_cast %42 : vector<1x8x8x32xf32> to vector<64x32xf32>
    %c0_67 = arith.constant 0 : index
    %c2_68 = arith.constant 2 : index
    %c2_69 = arith.constant 2 : index
    %c0_70 = arith.constant 0 : index
    %44 = vector.load %arg8[%c0_67, %c2_68, %c2_69, %c0_70] : memref<1x10x10x32xf32, #tpu.memory_space<vmem>>, vector<1x8x8x32xf32>
    %45 = vector.shape_cast %44 : vector<1x8x8x32xf32> to vector<64x32xf32>
    %46 = tpu.concatenate %29, %31, %33, %35, %37, %39, %41, %43, %45 in 1 : vector<64x32xf32>, vector<64x32xf32>, vector<64x32xf32>, vector<64x32xf32>, vector<64x32xf32>, vector<64x32xf32>, vector<64x32xf32>, vector<64x32xf32>, vector<64x32xf32> -> vector<64x288xf32>
    %c0_71 = arith.constant 0 : index
    %c0_72 = arith.constant 0 : index
    %47 = vector.load %arg4[%c0_71, %c0_72] : memref<288x128xf32, #tpu.memory_space<vmem>>, vector<288x128xf32>
    %cst_73 = arith.constant dense<0.000000e+00> : vector<64x128xf32>
    %48 = tpu.matmul %46, %47, %cst_73 {dimension_numbers = #tpu.dot_dimension_numbers<[1], [0], [0], [1], [0, 0, 1, 1], [], []>} : vector<64x288xf32>, vector<288x128xf32>, vector<64x128xf32> -> vector<64x128xf32>
    %c0_74 = arith.constant 0 : index
    %c0_75 = arith.constant 0 : index
    %49 = vector.load %arg5[%c0_74, %c0_75] : memref<1x128xf32, #tpu.memory_space<vmem>>, vector<1x128xf32>
    %50 = vector.broadcast %49 : vector<1x128xf32> to vector<64x128xf32>
    %51 = arith.addf %48, %50 : vector<64x128xf32>
    %cst_76 = arith.constant 0.000000e+00 : f32
    %52 = vector.broadcast %cst_76 : f32 to vector<64x128xf32>
    %53 = arith.maximumf %51, %52 : vector<64x128xf32>
    %54 = vector.shape_cast %53 : vector<64x128xf32> to vector<1x8x8x128xf32>
    %c0_77 = arith.constant 0 : index
    %c0_78 = arith.constant 0 : index
    %c0_79 = arith.constant 0 : index
    %c0_80 = arith.constant 0 : index
    %55 = vector.load %arg9[%c0_77, %c0_78, %c0_79, %c0_80] : memref<1x8x8x128xf32, #tpu.memory_space<vmem>>, vector<1x8x8x128xf32>
    tpu.vector_store %arg9[%c0_77, %c0_78, %c0_79, %c0_80], %54 {strides = array<i32>} : memref<1x8x8x128xf32, #tpu.memory_space<vmem>>, vector<1x8x8x128xf32>,
    %c0_81 = arith.constant 0 : index
    %c0_82 = arith.constant 0 : index
    %c0_83 = arith.constant 0 : index
    %c0_84 = arith.constant 0 : index
    %56 = tpu.strided_load %arg9[%c0_81, %c0_82, %c0_83, %c0_84] {strides = array<i32: 1, 1, 2, 1>} : memref<1x8x8x128xf32, #tpu.memory_space<vmem>>, vector<1x8x4x128xf32>
    %c0_85 = arith.constant 0 : index
    %c0_86 = arith.constant 0 : index
    %c1_87 = arith.constant 1 : index
    %c0_88 = arith.constant 0 : index
    %57 = tpu.strided_load %arg9[%c0_85, %c0_86, %c1_87, %c0_88] {strides = array<i32: 1, 1, 2, 1>} : memref<1x8x8x128xf32, #tpu.memory_space<vmem>>, vector<1x8x4x128xf32>
    %58 = arith.maximumf %56, %57 : vector<1x8x4x128xf32>
    %59 = vector.shape_cast %58 : vector<1x8x4x128xf32> to vector<1x4x2x4x128xf32>
    %60 = vector.extract_strided_slice %59 {offsets = [0, 0, 0, 0, 0], sizes = [1, 4, 1, 4, 128], strides = [1, 1, 1, 1, 1]} : vector<1x4x2x4x128xf32> to vector<1x4x1x4x128xf32>
    %61 = vector.shape_cast %60 : vector<1x4x1x4x128xf32> to vector<1x4x4x128xf32>
    %62 = vector.extract_strided_slice %59 {offsets = [0, 0, 1, 0, 0], sizes = [1, 4, 1, 4, 128], strides = [1, 1, 1, 1, 1]} : vector<1x4x2x4x128xf32> to vector<1x4x1x4x128xf32>
    %63 = vector.shape_cast %62 : vector<1x4x1x4x128xf32> to vector<1x4x4x128xf32>
    %64 = arith.maximumf %61, %63 : vector<1x4x4x128xf32>
    %c0_89 = arith.constant 0 : index
    %c0_90 = arith.constant 0 : index
    %c0_91 = arith.constant 0 : index
    %c0_92 = arith.constant 0 : index
    %65 = vector.load %arg6[%c0_89, %c0_90, %c0_91, %c0_92] : memref<1x4x4x128xf32, #tpu.memory_space<vmem>>, vector<1x4x4x128xf32>
    tpu.vector_store %arg6[%c0_89, %c0_90, %c0_91, %c0_92], %64 {strides = array<i32>} : memref<1x4x4x128xf32, #tpu.memory_space<vmem>>, vector<1x4x4x128xf32>,
    return
  }
  func.func @transform_0(%arg0: i32) -> (i32, i32, i32, i32) {
    %c0_i32 = arith.constant 0 : i32
    %c0_i32_0 = arith.constant 0 : i32
    %c0_i32_1 = arith.constant 0 : i32
    %c0_i32_2 = arith.constant 0 : i32
    return %arg0, %c0_i32, %c0_i32_0, %c0_i32_1 : i32, i32, i32, i32
  }
  func.func @transform_1(%arg0: i32) -> (i32, i32) {
    %c0_i32 = arith.constant 0 : i32
    %c0_i32_0 = arith.constant 0 : i32
    %c0_i32_1 = arith.constant 0 : i32
    return %c0_i32, %c0_i32_0 : i32, i32
  }
  func.func @transform_2(%arg0: i32) -> (i32, i32) {
    %c0_i32 = arith.constant 0 : i32
    %c0_i32_0 = arith.constant 0 : i32
    %c0_i32_1 = arith.constant 0 : i32
    return %c0_i32, %c0_i32_0 : i32, i32
  }
  func.func @transform_3(%arg0: i32) -> (i32, i32) {
    %c0_i32 = arith.constant 0 : i32
    %c0_i32_0 = arith.constant 0 : i32
    %c0_i32_1 = arith.constant 0 : i32
    return %c0_i32, %c0_i32_0 : i32, i32
  }
  func.func @transform_4(%arg0: i32) -> (i32, i32) {
    %c0_i32 = arith.constant 0 : i32
    %c0_i32_0 = arith.constant 0 : i32
    %c0_i32_1 = arith.constant 0 : i32
    return %c0_i32, %c0_i32_0 : i32, i32
  }
  func.func @transform_5(%arg0: i32) -> (i32, i32, i32, i32) {
    %c0_i32 = arith.constant 0 : i32
    %c0_i32_0 = arith.constant 0 : i32
    %c0_i32_1 = arith.constant 0 : i32
    %c0_i32_2 = arith.constant 0 : i32
    return %arg0, %c0_i32, %c0_i32_0, %c0_i32_1 : i32, i32, i32, i32
  }
}

</mosaic_0001>

<bundles_post_ra>
// kernel: conv_svhn_forward.1
= control target key start
LH: loop header
LB: loop body
LE: loop exit
PB: predicated region body
PF: predicated region fallthrough
CT: control target
= control target key end

     0   :  { %s2383_s18 = smov 0   ;;  %s3160_s0 = inlined_call_operand.vmem [shape: f32[2,18,16,9], index: 0, kind: input, shape index: {}]   ;;  %s3161_s1 = inlined_call_operand.vmem [shape: f32[27,32], index: 1, kind: input, shape index: {}]   ;;  %s3162_s2 = inlined_call_operand.vmem [shape: f32[1,32], index: 2, kind: input, shape index: {}]   ;;  %s3163_s3 = inlined_call_operand.vmem [shape: f32[288,128], index: 3, kind: input, shape index: {}]   ;;  %s3164_s4 = inlined_call_operand.vmem [shape: f32[1,128], index: 4, kind: input, shape index: {}]   ;;  %s3165_s5 = inlined_call_operand.vmem [shape: f32[2,4,4,128], index: 5, kind: output, shape index: {}]  }
   0x1 LB: > { %s1874_s19 = sadd.s32 4294967295, %s2345_s18   ;;  %p1878_p0 = scmp.ge.s32.totalorder %s2345_s18, 1  ;;  %s2345_s18 = sphi %s2383_s18, %s15_s18  }
   0x2   : > { %p187_p1 = scmp.lt.s32.totalorder %s2345_s18, 3 }
   0x4   : > { %p188_p2 = pnand %p1878_p0, %p187_p1 }
   0x5   : > { %p215_p3 = scmp.lt.s32.totalorder (!%p188_p2), %s1874_s19, 1  ;;  %s2347_s7 = smov (!%p188_p2), 18  }
   0x6   : > { %191 = sbr.rel (%p188_p2) target bundleno = 836 (0x344), region = 40  ;;  %s2348_s8 = smov (!%p188_p2), 9  }
   0x7   : > { %s2350_s17 = smov (!%p188_p2), 32  }
   0xb   : > { %v648_v0 = vld [vmem:[%s3161_s1 + $0x18] sm:$0x7]  ;;  %vm753_vm0 = vcmask 1042432   ;;  %v647_v1 = vld [vmem:[%s3161_s1 + $0x10] sm:$0xff]  ;;  %s3167_s19 = smov (!%p215_p3, %s1874_s19), 1  ;;  %v646_v2 = vld [vmem:[%s3161_s1 + $0x8] sm:$0xff] }
   0xc   : > { %2096 = vmatprep.subr.msk.mxu0 %vm753_vm0, %v648_v0  ;;  %s2204_s26 = smul.u32 288, %s3167_s19  ;;  %v645_v3 = vld [vmem:[%s3161_s1] sm:$0xff]  ;;  %vm579_vm1 = vcmask 72704   ;;  %vm612_vm2 = vcmask 146432   ;;  %vm656_vm3 = vcmask 220160   ;;  %vm1014_vm4 = vcmask 261120  }
   0xd   : > { %2097 = vmatpush3.msk.msra.mxu0 %vm753_vm0, %v648_v0  ;;  %vm1135_vm5 = vcmask 254976   ;;  %vm1437_vm6 = vcmask 523264   ;;  %vm1446_vm7 = vcmask 785408   ;;  %s1991_s21 = sshll.u32 %s3167_s19, 4 }
   0xe   : > { %2098 = vmatprep.subr.mxu0 %v647_v1  ;;  %s2409_s6 = scalar_lea.vmem %s3160_s0, %s2204_s26  ;;  %s224_s24 = scalar_lea.vmem %s3165_s5, %s1991_s21 }
   0xf   : > { %2099 = vmatpush3.msra.mxu0 %v647_v1  ;;  %v2412_v4 = vld [vmem:[%s2409_s6 + $0x20] sm:$0xff]  ;;  %v2415_v5 = vld [vmem:[%s2409_s6 + $0x10] sm:$0xff]  ;;  %v2422_v6 = vld [vmem:[%s2409_s6 + $0x28] sm:$0xff] }
  0x10   : > { %2100 = vmatprep.subr.mxu0 %v646_v2  ;;  %483 = vrot.lane.b32.xlu1 %v2412_v4, %s2347_s7  ;;  %v2425_v7 = vld [vmem:[%s2409_s6 + $0x18] sm:$0xff]  ;;  %v2439_v9 = vld [vmem:[%s2409_s6 + $0x30] sm:$0xff]  ;;  %v2450_v10 = vld [vmem:[%s2409_s6 + $0x48] sm:$0xff] }
  0x11   : > { %2101 = vmatpush3.msra.mxu0 %v646_v2  ;;  %355 = vrot.lane.b32.xlu0 %v2415_v5, %s2348_s8  ;;  %v2436_v8 = vld [vmem:[%s2409_s6 + $0x38] sm:$0xff]  ;;  %v2453_v11 = vld [vmem:[%s2409_s6 + $0x40] sm:$0xff]  ;;  %v2467_v13 = vld [vmem:[%s2409_s6 + $0x50] sm:$0xff] }
  0x12   : > { %2102 = vmatprep.subr.mxu0 %v645_v3  ;;  %v2464_v12 = vld [vmem:[%s2409_s6 + $0x58] sm:$0xff]  ;;  %v2478_v14 = vld [vmem:[%s2409_s6 + $0x68] sm:$0xff]  ;;  %v2481_v15 = vld [vmem:[%s2409_s6 + $0x60] sm:$0xff] }
  0x13   : > { %2103 = vmatpush3.msra.mxu0 %v645_v3  ;;  %v2492_v16 = vld [vmem:[%s2409_s6 + $0x78] sm:$0xff]  ;;  %v2495_v17 = vld [vmem:[%s2409_s6 + $0x70] sm:$0xff]  ;;  %v2506_v18 = vld [vmem:[%s2409_s6 + $0x88] sm:$0xff] }
  0x14   : > { %485 = vrot.lane.b32.xlu1 %v2422_v6, %s2347_s7  ;;  %v2509_v19 = vld [vmem:[%s2409_s6 + $0x80] sm:$0xff]  ;;  %v2520_v20 = vld [vmem:[%s2409_s6 + $0x98] sm:$0xff]  ;;  %v2523_v21 = vld [vmem:[%s2409_s6 + $0x90] sm:$0xff] }
  0x15   : > { %357 = vrot.lane.b32.xlu0 %v2425_v7, %s2348_s8  ;;  %v2534_v22 = vld [vmem:[%s2409_s6 + $0xa8] sm:$0xff]  ;;  %v2537_v23 = vld [vmem:[%s2409_s6 + $0xa0] sm:$0xff]  ;;  %v2548_v24 = vld [vmem:[%s2409_s6 + $0xb8] sm:$0xff] }
  0x16   : > { %v2551_v25 = vld [vmem:[%s2409_s6 + $0xb0] sm:$0xff]  ;;  %v2562_v26 = vld [vmem:[%s2409_s6 + $0xc8] sm:$0xff]  ;;  %v2565_v27 = vld [vmem:[%s2409_s6 + $0xc0] sm:$0xff] }
  0x17   : > { %v2576_v28 = vld [vmem:[%s2409_s6 + $0xd8] sm:$0xff]  ;;  %v2579_v29 = vld [vmem:[%s2409_s6 + $0xd0] sm:$0xff]  ;;  %v2590_v30 = vld [vmem:[%s2409_s6 + $0xe8] sm:$0xff] }
  0x18   : > { %361 = vrot.lane.b32.xlu1 %v2422_v6, %s2348_s8  ;;  %v2593_v31 = vld [vmem:[%s2409_s6 + $0xe0] sm:$0xff]  ;;  %v2604_v32 = vld [vmem:[%s2409_s6 + $0xf8] sm:$0xff]  ;;  %v2607_v33 = vld [vmem:[%s2409_s6 + $0xf0] sm:$0xff] }
  0x19   : > { %359 = vrot.lane.b32.xlu0 %v2412_v4, %s2348_s8  ;;  %v225_v34 = vld [vmem:[%s2409_s6] sm:$0xff]  ;;  %v1943_v35 = vld [vmem:[%s2409_s6 + $0x108] sm:$0xff]  ;;  %v1945_v46 = vld [vmem:[%s2409_s6 + $0x118] sm:$0xff] }
  0x1a   : > { %v1942_v36 = vld [vmem:[%s2409_s6 + $0x100] sm:$0xff]  ;;  %v226_v41 = vld [vmem:[%s2409_s6 + $0x8] sm:$0xff]  ;;  %v1944_v47 = vld [vmem:[%s2409_s6 + $0x110] sm:$0xff] }
  0x1c   : > { %489 = vrot.lane.b32.xlu1 %v2436_v8, %s2347_s7 }
  0x1d   : > { %487 = vrot.lane.b32.xlu0 %v2439_v9, %s2347_s7 }
  0x20   : > { %365 = vrot.lane.b32.xlu1 %v2436_v8, %s2348_s8 }
  0x21   : > { %363 = vrot.lane.b32.xlu0 %v2439_v9, %s2348_s8 }
  0x24   : > { %493 = vrot.lane.b32.xlu1 %v2450_v10, %s2347_s7 }
  0x25   : > { %491 = vrot.lane.b32.xlu0 %v2453_v11, %s2347_s7 }
  0x28   : > { %369 = vrot.lane.b32.xlu1 %v2450_v10, %s2348_s8 }
  0x29   : > { %367 = vrot.lane.b32.xlu0 %v2453_v11, %s2348_s8 }
  0x2c   : > { %497 = vrot.lane.b32.xlu1 %v2464_v12, %s2347_s7 }
  0x2d   : > { %495 = vrot.lane.b32.xlu0 %v2467_v13, %s2347_s7 }
  0x30   : > { %373 = vrot.lane.b32.xlu1 %v2464_v12, %s2348_s8 }
  0x31   : > { %371 = vrot.lane.b32.xlu0 %v2467_v13, %s2348_s8 }
  0x34   : > { %501 = vrot.lane.b32.xlu1 %v2478_v14, %s2347_s7 }
  0x35   : > { %499 = vrot.lane.b32.xlu0 %v2481_v15, %s2347_s7 }
  0x38   : > { %377 = vrot.lane.b32.xlu1 %v2478_v14, %s2348_s8 }
  0x39   : > { %375 = vrot.lane.b32.xlu0 %v2481_v15, %s2348_s8 }
  0x3c   : > { %505 = vrot.lane.b32.xlu1 %v2492_v16, %s2347_s7 }
  0x3d   : > { %503 = vrot.lane.b32.xlu0 %v2495_v17, %s2347_s7 }
  0x40   : > { %381 = vrot.lane.b32.xlu1 %v2492_v16, %s2348_s8 }
  0x41   : > { %379 = vrot.lane.b32.xlu0 %v2495_v17, %s2348_s8 }
  0x44   : > { %509 = vrot.lane.b32.xlu1 %v2506_v18, %s2347_s7 }
  0x45   : > { %507 = vrot.lane.b32.xlu0 %v2509_v19, %s2347_s7 }
  0x48   : > { %385 = vrot.lane.b32.xlu1 %v2506_v18, %s2348_s8 }
  0x49   : > { %383 = vrot.lane.b32.xlu0 %v2509_v19, %s2348_s8 }
  0x4c   : > { %513 = vrot.lane.b32.xlu1 %v2520_v20, %s2347_s7 }
  0x4d   : > { %511 = vrot.lane.b32.xlu0 %v2523_v21, %s2347_s7 }
  0x50   : > { %389 = vrot.lane.b32.xlu1 %v2520_v20, %s2348_s8 }
  0x51   : > { %387 = vrot.lane.b32.xlu0 %v2523_v21, %s2348_s8 }
  0x54   : > { %517 = vrot.lane.b32.xlu1 %v2534_v22, %s2347_s7 }
  0x55   : > { %515 = vrot.lane.b32.xlu0 %v2537_v23, %s2347_s7 }
  0x58   : > { %393 = vrot.lane.b32.xlu1 %v2534_v22, %s2348_s8 }
  0x59   : > { %391 = vrot.lane.b32.xlu0 %v2537_v23, %s2348_s8 }
  0x5c   : > { %521 = vrot.lane.b32.xlu1 %v2548_v24, %s2347_s7 }
  0x5d   : > { %519 = vrot.lane.b32.xlu0 %v2551_v25, %s2347_s7 }
  0x60   : > { %397 = vrot.lane.b32.xlu1 %v2548_v24, %s2348_s8 }
  0x61   : > { %395 = vrot.lane.b32.xlu0 %v2551_v25, %s2348_s8 }
  0x64   : > { %525 = vrot.lane.b32.xlu1 %v2562_v26, %s2347_s7 }
  0x65   : > { %523 = vrot.lane.b32.xlu0 %v2565_v27, %s2347_s7 }
  0x68   : > { %401 = vrot.lane.b32.xlu1 %v2562_v26, %s2348_s8 }
  0x69   : > { %399 = vrot.lane.b32.xlu0 %v2565_v27, %s2348_s8 }
  0x6c   : > { %529 = vrot.lane.b32.xlu1 %v2576_v28, %s2347_s7 }
  0x6d   : > { %527 = vrot.lane.b32.xlu0 %v2579_v29, %s2347_s7 }
  0x70   : > { %405 = vrot.lane.b32.xlu1 %v2576_v28, %s2348_s8 }
  0x71   : > { %403 = vrot.lane.b32.xlu0 %v2579_v29, %s2348_s8 }
  0x74   : > { %533 = vrot.lane.b32.xlu1 %v2590_v30, %s2347_s7 }
  0x75   : > { %531 = vrot.lane.b32.xlu0 %v2593_v31, %s2347_s7 }
  0x78   : > { %409 = vrot.lane.b32.xlu1 %v2590_v30, %s2348_s8 }
  0x79   : > { %407 = vrot.lane.b32.xlu0 %v2593_v31, %s2348_s8 }
  0x7c   : > { %537 = vrot.lane.b32.xlu1 %v2604_v32, %s2347_s7 }
  0x7d   : > { %535 = vrot.lane.b32.xlu0 %v2607_v33, %s2347_s7 }
  0x80   : > { %413 = vrot.lane.b32.xlu1 %v2604_v32, %s2348_s8 }
  0x81   : > { %411 = vrot.lane.b32.xlu0 %v2607_v33, %s2348_s8 }
  0x82   : > { %v484_v37 = vpop.permute.xlu1 %483 }
  0x83   : > { %v356_v38 = vpop.permute.xlu0 %355 }
  0x84   : > { %v580_v39 = vsel %vm579_vm1, %v225_v34, %v356_v38  ;;  %541 = vrot.lane.b32.xlu1 %v1943_v35, %s2347_s7 }
  0x85   : > { %539 = vrot.lane.b32.xlu0 %v1942_v36, %s2347_s7  ;;  %v613_v40 = vsel %vm612_vm2, %v580_v39, %v484_v37 }
  0x86   : > { %2104 = vmatprep.mubr.msk.f32.mxu0 %vm656_vm3, %v613_v40  ;;  %v486_v42 = vpop.permute.xlu1 %485 }
  0x87   : > { %v358_v43 = vpop.permute.xlu0 %357 }
  0x88   : > { %v581_v44 = vsel %vm579_vm1, %v226_v41, %v358_v43  ;;  %417 = vrot.lane.b32.xlu1 %v1943_v35, %s2348_s8 }
  0x89   : > { %415 = vrot.lane.b32.xlu0 %v1942_v36, %s2348_s8  ;;  %v614_v45 = vsel %vm612_vm2, %v581_v44, %v486_v42  ;;  %s2352_s8 = smov 96  }
  0x8a   : > { %2105 = vmatmul.mubr.msk.f32.vlgmr.msra.gmra.mxu0 %vm656_vm3, %v614_v45  ;;  %v362_v48 = vpop.permute.xlu1 %361 }
  0x8b   : > { %v360_v49 = vpop.permute.xlu0 %359  ;;  %v583_v50 = vsel %vm579_vm1, %v2425_v7, %v362_v48 }
  0x8c   : > { %545 = vrot.lane.b32.xlu1 %v1945_v46, %s2347_s7  ;;  %v582_v51 = vsel %vm579_vm1, %v2415_v5, %v360_v49 }
  0x8d   : > { %543 = vrot.lane.b32.xlu0 %v1944_v47, %s2347_s7  ;;  %s2351_s7 = smov 64  }
  0x8e   : > { %v490_v52 = vpop.permute.xlu1 %489 }
  0x8f   : > { %v488_v53 = vpop.permute.xlu0 %487  ;;  %v616_v54 = vsel %vm612_vm2, %v583_v50, %v490_v52 }
  0x90   : > { %v615_v55 = vsel %vm612_vm2, %v582_v51, %v488_v53 }
  0x91   : > { %2107 = vmatprep.mubr.msk.f32.mxu0 %vm656_vm3, %v615_v55 }
  0x92   : > { %2108 = vmatmul.mubr.msk.f32.gmra.mxu0 %vm656_vm3, %v616_v54  ;;  %v366_v56 = vpop.permute.xlu1 %365 }
  0x93   : > { %v364_v57 = vpop.permute.xlu0 %363  ;;  %v585_v58 = vsel %vm579_vm1, %v2422_v6, %v366_v56 }
  0x94   : > { %v584_v59 = vsel %vm579_vm1, %v2412_v4, %v364_v57 }
  0x96   : > { %v494_v60 = vpop.permute.xlu1 %493 }
  0x97   : > { %v492_v61 = vpop.permute.xlu0 %491  ;;  %v618_v62 = vsel %vm612_vm2, %v585_v58, %v494_v60 }
  0x98   : > { %v617_v63 = vsel %vm612_vm2, %v584_v59, %v492_v61 }
  0x99   : > { %2110 = vmatprep.mubr.msk.f32.mxu0 %vm656_vm3, %v617_v63 }
  0x9a   : > { %2111 = vmatmul.mubr.msk.f32.gmra.mxu0 %vm656_vm3, %v618_v62  ;;  %v370_v0 = vpop.permute.xlu1 %369 }
  0x9b   : > { %v368_v1 = vpop.permute.xlu0 %367  ;;  %v587_v2 = vsel %vm579_vm1, %v2436_v8, %v370_v0 }
  0x9c   : > { %v586_v3 = vsel %vm579_vm1, %v2439_v9, %v368_v1 }
  0x9e   : > { %v498_v5 = vpop.permute.xlu1 %497 }
  0x9f   : > { %v496_v4 = vpop.permute.xlu0 %495  ;;  %v620_v6 = vsel %vm612_vm2, %v587_v2, %v498_v5 }
  0xa0   : > { %v619_v7 = vsel %vm612_vm2, %v586_v3, %v496_v4 }
  0xa1   : > { %2113 = vmatprep.mubr.msk.f32.mxu0 %vm656_vm3, %v619_v7 }
  0xa2   : > { %2114 = vmatmul.mubr.msk.f32.gmra.mxu0 %vm656_vm3, %v620_v6  ;;  %v374_v34 = vpop.permute.xlu1 %373 }
  0xa3   : > { %v372_v35 = vpop.permute.xlu0 %371  ;;  %v589_v36 = vsel %vm579_vm1, %v2450_v10, %v374_v34 }
  0xa4   : > { %v588_v8 = vsel %vm579_vm1, %v2453_v11, %v372_v35 }
  0xa6   : > { %v502_v37 = vpop.permute.xlu1 %501 }
  0xa7   : > { %v500_v9 = vpop.permute.xlu0 %499  ;;  %v622_v38 = vsel %vm612_vm2, %v589_v36, %v502_v37 }
  0xa8   : > { %v621_v39 = vsel %vm612_vm2, %v588_v8, %v500_v9 }
  0xa9   : > { %2116 = vmatprep.mubr.msk.f32.mxu0 %vm656_vm3, %v621_v39 }
  0xaa   : > { %2117 = vmatmul.mubr.msk.f32.gmra.mxu0 %vm656_vm3, %v622_v38  ;;  %v378_v40 = vpop.permute.xlu1 %377 }
  0xab   : > { %v376_v41 = vpop.permute.xlu0 %375  ;;  %v591_v42 = vsel %vm579_vm1, %v2464_v12, %v378_v40 }
  0xac   : > { %v590_v10 = vsel %vm579_vm1, %v2467_v13, %v376_v41 }
  0xae   : > { %v506_v43 = vpop.permute.xlu1 %505 }
  0xaf   : > { %v504_v11 = vpop.permute.xlu0 %503  ;;  %v624_v44 = vsel %vm612_vm2, %v591_v42, %v506_v43  ;;  %v2349_v43 = vmov 0.0  }
  0xb0   : > { %v623_v45 = vsel %vm612_vm2, %v590_v10, %v504_v11  ;;  %1137 = vst.msk [vmem:[#allocation3 + $0x10] sm:$0xff] %vm1014_vm4, %v2349_v43  ;;  %1139 = vst.msk [vmem:[#allocation3 + $0x20] sm:$0xff] %vm1014_vm4, %v2349_v43 }
  0xb1   : > { %2119 = vmatprep.mubr.msk.f32.mxu0 %vm656_vm3, %v623_v45  ;;  %1138 = vst.msk [vmem:[#allocation3 + $0x18] sm:$0x3] %vm1135_vm5, %v2349_v43  ;;  %1140 = vst.msk [vmem:[#allocation3 + $0x28] sm:$0x3] %vm1135_vm5, %v2349_v43 }
  0xb2   : > { %2120 = vmatmul.mubr.msk.f32.gmra.mxu0 %vm656_vm3, %v624_v44  ;;  %v382_v46 = vpop.permute.xlu1 %381  ;;  %1134 = vst.msk [vmem:[#allocation3] sm:$0xff] %vm1014_vm4, %v2349_v43  ;;  %1141 = vst.msk [vmem:[#allocation3 + $0x30] sm:$0xff] %vm1014_vm4, %v2349_v43 }
  0xb3   : > { %v380_v47 = vpop.permute.xlu0 %379  ;;  %v593_v48 = vsel %vm579_vm1, %v2478_v14, %v382_v46  ;;  %1136 = vst.msk [vmem:[#allocation3 + $0x8] sm:$0x3] %vm1135_vm5, %v2349_v43  ;;  %1142 = vst.msk [vmem:[#allocation3 + $0x38] sm:$0x3] %vm1135_vm5, %v2349_v43 }
  0xb4   : > { %v592_v12 = vsel %vm579_vm1, %v2481_v15, %v380_v47  ;;  %1143 = vst.msk [vmem:[#allocation3 + $0x40] sm:$0xff] %vm1014_vm4, %v2349_v43  ;;  %1145 = vst.msk [vmem:[#allocation3 + $0x50] sm:$0xff] %vm1014_vm4, %v2349_v43 }
  0xb5   : > { %1144 = vst.msk [vmem:[#allocation3 + $0x48] sm:$0x3] %vm1135_vm5, %v2349_v43  ;;  %1146 = vst.msk [vmem:[#allocation3 + $0x58] sm:$0x3] %vm1135_vm5, %v2349_v43 }
  0xb6   : > { %v510_v49 = vpop.permute.xlu1 %509  ;;  %1147 = vst.msk [vmem:[#allocation3 + $0x60] sm:$0xff] %vm1014_vm4, %v2349_v43  ;;  %1149 = vst.msk [vmem:[#allocation3 + $0x70] sm:$0xff] %vm1014_vm4, %v2349_v43 }
  0xb7   : > { %v508_v13 = vpop.permute.xlu0 %507  ;;  %v626_v50 = vsel %vm612_vm2, %v593_v48, %v510_v49  ;;  %1148 = vst.msk [vmem:[#allocation3 + $0x68] sm:$0x3] %vm1135_vm5, %v2349_v43  ;;  %1150 = vst.msk [vmem:[#allocation3 + $0x78] sm:$0x3] %vm1135_vm5, %v2349_v43 }
  0xb8   : > { %v625_v51 = vsel %vm612_vm2, %v592_v12, %v508_v13  ;;  %1151 = vst.msk [vmem:[#allocation3 + $0x80] sm:$0xff] %vm1014_vm4, %v2349_v43  ;;  %1153 = vst.msk [vmem:[#allocation3 + $0x90] sm:$0xff] %vm1014_vm4, %v2349_v43 }
  0xb9   : > { %2122 = vmatprep.mubr.msk.f32.mxu0 %vm656_vm3, %v625_v51  ;;  %1152 = vst.msk [vmem:[#allocation3 + $0x88] sm:$0x3] %vm1135_vm5, %v2349_v43  ;;  %1154 = vst.msk [vmem:[#allocation3 + $0x98] sm:$0x3] %vm1135_vm5, %v2349_v43  ;;  %v1494_v43 = vld [vmem:[%s3163_s3 + $0x78] sm:$0xff] }
  0xba   : > { %2123 = vmatmul.mubr.msk.f32.gmra.mxu0 %vm656_vm3, %v626_v50  ;;  %v386_v52 = vpop.permute.xlu1 %385 }
  0xbb   : > { %v384_v53 = vpop.permute.xlu0 %383  ;;  %v595_v54 = vsel %vm579_vm1, %v2492_v16, %v386_v52 }
  0xbc   : > { %v594_v14 = vsel %vm579_vm1, %v2495_v17, %v384_v53 }
  0xbe   : > { %v514_v55 = vpop.permute.xlu1 %513 }
  0xbf   : > { %v512_v15 = vpop.permute.xlu0 %511  ;;  %v628_v56 = vsel %vm612_vm2, %v595_v54, %v514_v55 }
  0xc0   : > { %v627_v57 = vsel %vm612_vm2, %v594_v14, %v512_v15 }
  0xc1   : > { %2125 = vmatprep.mubr.msk.f32.mxu0 %vm656_vm3, %v627_v57 }
  0xc2   : > { %2126 = vmatmul.mubr.msk.f32.gmra.mxu0 %vm656_vm3, %v628_v56  ;;  %v390_v58 = vpop.permute.xlu1 %389 }
  0xc3   : > { %v388_v59 = vpop.permute.xlu0 %387  ;;  %v597_v60 = vsel %vm579_vm1, %v2506_v18, %v390_v58 }
  0xc4   : > { %v596_v16 = vsel %vm579_vm1, %v2509_v19, %v388_v59 }
  0xc6   : > { %v518_v61 = vpop.permute.xlu1 %517 }
  0xc7   : > { %v516_v17 = vpop.permute.xlu0 %515  ;;  %v630_v62 = vsel %vm612_vm2, %v597_v60, %v518_v61 }
  0xc8   : > { %v629_v63 = vsel %vm612_vm2, %v596_v16, %v516_v17  ;;  %v2778_v16 = vld [vmem:[%s3162_s2] ss:$0 sm:$0xff] }
  0xc9   : > { %2128 = vmatprep.mubr.msk.f32.mxu0 %vm656_vm3, %v629_v63 }
  0xca   : > { %2129 = vmatmul.mubr.msk.f32.gmra.mxu0 %vm656_vm3, %v630_v62  ;;  %v394_v0 = vpop.permute.xlu1 %393 }
  0xcb   : > { %v392_v1 = vpop.permute.xlu0 %391  ;;  %v599_v2 = vsel %vm579_vm1, %v2520_v20, %v394_v0 }
  0xcc   : > { %v598_v18 = vsel %vm579_vm1, %v2523_v21, %v392_v1 }
  0xce   : > { %v522_v3 = vpop.permute.xlu1 %521 }
  0xcf   : > { %v520_v19 = vpop.permute.xlu0 %519  ;;  %v632_v5 = vsel %vm612_vm2, %v599_v2, %v522_v3 }
  0xd0   : > { %v631_v4 = vsel %vm612_vm2, %v598_v18, %v520_v19 }
  0xd1   : > { %2131 = vmatprep.mubr.msk.f32.mxu0 %vm656_vm3, %v631_v4 }
  0xd2   : > { %2132 = vmatmul.mubr.msk.f32.gmra.mxu0 %vm656_vm3, %v632_v5  ;;  %v398_v6 = vpop.permute.xlu1 %397 }
  0xd3   : > { %v396_v7 = vpop.permute.xlu0 %395  ;;  %v601_v34 = vsel %vm579_vm1, %v2534_v22, %v398_v6 }
  0xd4   : > { %v600_v20 = vsel %vm579_vm1, %v2537_v23, %v396_v7 }
  0xd6   : > { %v526_v35 = vpop.permute.xlu1 %525 }
  0xd7   : > { %v524_v21 = vpop.permute.xlu0 %523  ;;  %v634_v36 = vsel %vm612_vm2, %v601_v34, %v526_v35 }
  0xd8   : > { %v633_v8 = vsel %vm612_vm2, %v600_v20, %v524_v21 }
  0xd9   : > { %2134 = vmatprep.mubr.msk.f32.mxu0 %vm656_vm3, %v633_v8 }
  0xda   : > { %2135 = vmatmul.mubr.msk.f32.gmra.mxu0 %vm656_vm3, %v634_v36  ;;  %v402_v37 = vpop.permute.xlu1 %401 }
  0xdb   : > { %v400_v9 = vpop.permute.xlu0 %399  ;;  %v603_v38 = vsel %vm579_vm1, %v2548_v24, %v402_v37 }
  0xdc   : > { %v602_v22 = vsel %vm579_vm1, %v2551_v25, %v400_v9 }
  0xde   : > { %v530_v39 = vpop.permute.xlu1 %529 }
  0xdf   : > { %v528_v23 = vpop.permute.xlu0 %527  ;;  %v636_v40 = vsel %vm612_vm2, %v603_v38, %v530_v39 }
  0xe0   : > { %v635_v41 = vsel %vm612_vm2, %v602_v22, %v528_v23  ;;  %v1510_v23 = vld [vmem:[%s3163_s3 + $0xf8] sm:$0xff] }
  0xe1   : > { %2137 = vmatprep.mubr.msk.f32.mxu0 %vm656_vm3, %v635_v41  ;;  %2172 = vmatprep.subr.mxu1 %v1510_v23 }
  0xe2   : > { %2138 = vmatmul.mubr.msk.f32.gmra.mxu0 %vm656_vm3, %v636_v40  ;;  %v406_v42 = vpop.permute.xlu1 %405  ;;  %2028 = vmatprep.subr.mxu0 %v1510_v23 }
  0xe3   : > { %v404_v10 = vpop.permute.xlu0 %403  ;;  %v605_v24 = vsel %vm579_vm1, %v2562_v26, %v406_v42  ;;  %2188 = vmatpush3.msra.mxu1 %v1494_v43  ;;  %2029 = vmatpush3.msra.mxu0 %v1494_v43  ;;  %v1480_v43 = vld [vmem:[%s3163_s3 + $0x8] sm:$0xff] }
  0xe4   : > { %v604_v25 = vsel %vm579_vm1, %v2565_v27, %v404_v10 }
  0xe6   : > { %v534_v11 = vpop.permute.xlu1 %533 }
  0xe7   : > { %v532_v44 = vpop.permute.xlu0 %531  ;;  %v638_v45 = vsel %vm612_vm2, %v605_v24, %v534_v11  ;;  %v1509_v24 = vld [vmem:[%s3163_s3 + $0xf0] sm:$0xff]  ;;  %v1508_v11 = vld [vmem:[%s3163_s3 + $0xe8] sm:$0xff] }
  0xe8   : > { %v637_v46 = vsel %vm612_vm2, %v604_v25, %v532_v44  ;;  %v1493_v25 = vld [vmem:[%s3163_s3 + $0x70] sm:$0xff]  ;;  %2173 = vmatprep.subr.mxu1 %v1509_v24  ;;  %2030 = vmatprep.subr.mxu0 %v1509_v24 }
  0xe9   : > { %2140 = vmatprep.mubr.msk.f32.mxu0 %vm656_vm3, %v637_v46  ;;  %2189 = vmatpush3.msra.mxu1 %v1493_v25  ;;  %v1492_v46 = vld [vmem:[%s3163_s3 + $0x68] sm:$0xff] }
  0xea   : > { %2141 = vmatmul.mubr.msk.f32.gmra.mxu0 %vm656_vm3, %v638_v45  ;;  %v410_v47 = vpop.permute.xlu1 %409  ;;  %2174 = vmatprep.subr.mxu1 %v1508_v11 }
  0xeb   : > { %v408_v48 = vpop.permute.xlu0 %407  ;;  %v607_v12 = vsel %vm579_vm1, %v2576_v28, %v410_v47  ;;  %2031 = vmatpush3.msra.mxu0 %v1493_v25  ;;  %v1507_v47 = vld [vmem:[%s3163_s3 + $0xe0] sm:$0xff]  ;;  %2190 = vmatpush3.msra.mxu1 %v1492_v46 }
  0xec   : > { %v606_v26 = vsel %vm579_vm1, %v2579_v29, %v408_v48  ;;  %v1491_v48 = vld [vmem:[%s3163_s3 + $0x60] sm:$0xff]  ;;  %2032 = vmatprep.subr.mxu0 %v1508_v11  ;;  %2175 = vmatprep.subr.mxu1 %v1507_v47 }
  0xed   : > { %2033 = vmatpush3.msra.mxu0 %v1492_v46  ;;  %2191 = vmatpush3.msra.mxu1 %v1491_v48  ;;  %v1495_v11 = vld [vmem:[%s3163_s3 + $0x80] sm:$0xff] }
  0xee   : > { %v538_v49 = vpop.permute.xlu1 %537  ;;  %2034 = vmatprep.subr.mxu0 %v1507_v47  ;;  %v1479_v47 = vld [vmem:[%s3163_s3] sm:$0xff] }
  0xef   : > { %v536_v27 = vpop.permute.xlu0 %535  ;;  %v640_v13 = vsel %vm612_vm2, %v607_v12, %v538_v49  ;;  %2035 = vmatpush3.msra.mxu0 %v1491_v48 }
  0xf0   : > { %v639_v50 = vsel %vm612_vm2, %v606_v26, %v536_v27  ;;  %v1506_v27 = vld [vmem:[%s3163_s3 + $0xd8] sm:$0xff] }
  0xf1   : > { %2143 = vmatprep.mubr.msk.f32.mxu0 %vm656_vm3, %v639_v50  ;;  %2176 = vmatprep.subr.mxu1 %v1506_v27 }
  0xf2   : > { %2144 = vmatmul.mubr.msk.f32.gmra.mxu0 %vm656_vm3, %v640_v13  ;;  %v414_v51 = vpop.permute.xlu1 %413  ;;  %v1490_v13 = vld [vmem:[%s3163_s3 + $0x58] sm:$0xff]  ;;  %2036 = vmatprep.subr.mxu0 %v1506_v27 }
  0xf3   : > { %v412_v52 = vpop.permute.xlu0 %411  ;;  %v609_v53 = vsel %vm579_vm1, %v2590_v30, %v414_v51  ;;  %2192 = vmatpush3.msra.mxu1 %v1490_v13  ;;  %2037 = vmatpush3.msra.mxu0 %v1490_v13 }
  0xf4   : > { %v608_v28 = vsel %vm579_vm1, %v2593_v31, %v412_v52  ;;  %v1505_v52 = vld [vmem:[%s3163_s3 + $0xd0] sm:$0xff] }
  0xf5   : > { %2177 = vmatprep.subr.mxu1 %v1505_v52  ;;  %2038 = vmatprep.subr.mxu0 %v1505_v52 }
  0xf6   : > { %v542_v54 = vpop.permute.xlu1 %541 }
  0xf7   : > { %v540_v29 = vpop.permute.xlu0 %539  ;;  %v642_v14 = vsel %vm612_vm2, %v609_v53, %v542_v54 }
  0xf8   : > { %v641_v55 = vsel %vm612_vm2, %v608_v28, %v540_v29 }
  0xf9   : > { %2146 = vmatprep.mubr.msk.f32.mxu0 %vm656_vm3, %v641_v55 }
  0xfa   : > { %2147 = vmatmul.mubr.msk.f32.gmra.mxu0 %vm656_vm3, %v642_v14  ;;  %v418_v15 = vpop.permute.xlu1 %417 }
  0xfb   : > { %v416_v56 = vpop.permute.xlu0 %415  ;;  %v611_v57 = vsel %vm579_vm1, %v2604_v32, %v418_v15  ;;  %v1489_v15 = vld [vmem:[%s3163_s3 + $0x50] sm:$0xff] }
  0xfc   : > { %v610_v30 = vsel %vm579_vm1, %v2607_v33, %v416_v56  ;;  %v1504_v56 = vld [vmem:[%s3163_s3 + $0xc8] sm:$0xff]  ;;  %2193 = vmatpush3.msra.mxu1 %v1489_v15  ;;  %2039 = vmatpush3.msra.mxu0 %v1489_v15 }
  0xfd   : > { %2178 = vmatprep.subr.mxu1 %v1504_v56  ;;  %2040 = vmatprep.subr.mxu0 %v1504_v56 }
  0xfe   : > { %v546_v58 = vpop.permute.xlu1 %545 }
  0xff   : > { %v544_v31 = vpop.permute.xlu0 %543  ;;  %v644_v59 = vsel %vm612_vm2, %v611_v57, %v546_v58  ;;  %v1488_v57 = vld [vmem:[%s3163_s3 + $0x48] sm:$0xff] }
 0x100   : > { %v643_v60 = vsel %vm612_vm2, %v610_v30, %v544_v31  ;;  %v1503_v31 = vld [vmem:[%s3163_s3 + $0xc0] sm:$0xff]  ;;  %2194 = vmatpush3.msra.mxu1 %v1488_v57  ;;  %2041 = vmatpush3.msra.mxu0 %v1488_v57 }
 0x101   : > { %2149 = vmatprep.mubr.msk.f32.mxu0 %vm656_vm3, %v643_v60  ;;  %v1487_v60 = vld [vmem:[%s3163_s3 + $0x40] sm:$0xff]  ;;  %2179 = vmatprep.subr.mxu1 %v1503_v31 }
 0x102   : > { %2150 = vmatmul.mubr.msk.f32.gmra.mxu0 %vm656_vm3, %v644_v59  ;;  %2042 = vmatprep.subr.mxu0 %v1503_v31 }
 0x103   : > { %2195 = vmatpush3.msra.mxu1 %v1487_v60  ;;  %2043 = vmatpush3.msra.mxu0 %v1487_v60 }
 0x14a   : > { %v2106_v61 = vpop.f32.mrf.mxu0 }
 0x14b   : > { %v829_v32 = vadd.f32 %v2106_v61, %v2778_v16 }
 0x14c   : > { %v823_v17 = vpop.f32.mrf.mxu0 }
 0x14d   : > { %v983_v33 = vmax.f32 %v829_v32, 0.0  ;;  %v824_v62 = vadd.f32 %v2778_v16, %v823_v17  ;;  %v1502_v17 = vld [vmem:[%s3163_s3 + $0xb8] sm:$0xff] }
 0x14e   : > { %2180 = vmatprep.subr.mxu1 %v1502_v17  ;;  %2044 = vmatprep.subr.mxu0 %v1502_v17 }
 0x14f   : > { %1016 = vst.msk [vmem:[#allocation2 + $0x8] sm:$0xff] %vm1014_vm4, %v983_v33  ;;  %v982_v63 = vmax.f32 %v824_v62, 0.0  ;;  %v1486_v33 = vld [vmem:[%s3163_s3 + $0x38] sm:$0xff] }
 0x150   : > { %2196 = vmatpush3.msra.mxu1 %v1486_v33  ;;  %2045 = vmatpush3.msra.mxu0 %v1486_v33 }
 0x151   : > { %1015 = vst.msk [vmem:[#allocation2] sm:$0xff] %vm1014_vm4, %v982_v63  ;;  %v1501_v63 = vld [vmem:[%s3163_s3 + $0xb0] sm:$0xff] }
 0x152   : > { %v2109_v0 = vpop.f32.mrf.mxu0  ;;  %2181 = vmatprep.subr.mxu1 %v1501_v63  ;;  %2046 = vmatprep.subr.mxu0 %v1501_v63 }
 0x153   : > { %v839_v1 = vadd.f32 %v2109_v0, %v2778_v16  ;;  %v1485_v0 = vld [vmem:[%s3163_s3 + $0x30] sm:$0xff] }
 0x154   : > { %v833_v2 = vpop.f32.mrf.mxu0  ;;  %2197 = vmatpush3.msra.mxu1 %v1485_v0  ;;  %2047 = vmatpush3.msra.mxu0 %v1485_v0 }
 0x155   : > { %v985_v18 = vmax.f32 %v839_v1, 0.0  ;;  %v834_v3 = vadd.f32 %v2778_v16, %v833_v2  ;;  %v1500_v1 = vld [vmem:[%s3163_s3 + $0xa8] sm:$0xff] }
 0x156   : > { %2182 = vmatprep.subr.mxu1 %v1500_v1  ;;  %2048 = vmatprep.subr.mxu0 %v1500_v1 }
 0x157   : > { %1018 = vst.msk [vmem:[#allocation2 + $0x18] sm:$0xff] %vm1014_vm4, %v985_v18  ;;  %v984_v19 = vmax.f32 %v834_v3, 0.0  ;;  %v1484_v18 = vld [vmem:[%s3163_s3 + $0x28] sm:$0xff] }
 0x158   : > { %v1047_v20 = vld [vmem:[#allocation2] ss:$2 sm:$0xff]  ;;  %v1079_v35 = vld [vmem:[#allocation2 + $0x1] ss:$2 sm:$0xff]  ;;  %2198 = vmatpush3.msra.mxu1 %v1484_v18  ;;  %2049 = vmatpush3.msra.mxu0 %v1484_v18 }
 0x159   : > { %1017 = vst.msk [vmem:[#allocation2 + $0x10] sm:$0xff] %vm1014_vm4, %v984_v19  ;;  %v1110_v37 = vmax.f32 %v1047_v20, %v1079_v35  ;;  %v1499_v19 = vld [vmem:[%s3163_s3 + $0xa0] sm:$0xff] }
 0x15a   : > { %v2112_v5 = vpop.f32.mrf.mxu0  ;;  %2183 = vmatprep.subr.mxu1 %v1499_v19  ;;  %2050 = vmatprep.subr.mxu0 %v1499_v19 }
 0x15b   : > { %v849_v4 = vadd.f32 %v2112_v5, %v2778_v16 }
 0x15c   : > { %v843_v6 = vpop.f32.mrf.mxu0 }
 0x15d   : > { %v987_v7 = vmax.f32 %v849_v4, 0.0  ;;  %v844_v34 = vadd.f32 %v2778_v16, %v843_v6 }
 0x15f   : > { %1020 = vst.msk [vmem:[#allocation2 + $0x28] sm:$0xff] %vm1014_vm4, %v987_v7  ;;  %v986_v21 = vmax.f32 %v844_v34, 0.0  ;;  %v1483_v7 = vld [vmem:[%s3163_s3 + $0x20] sm:$0xff] }
 0x160   : > { %v1049_v36 = vld [vmem:[#allocation2 + $0x10] ss:$2 sm:$0xff]  ;;  %v1081_v8 = vld [vmem:[#allocation2 + $0x11] ss:$2 sm:$0xff]  ;;  %2199 = vmatpush3.msra.mxu1 %v1483_v7  ;;  %2051 = vmatpush3.msra.mxu0 %v1483_v7 }
 0x161   : > { %v1111_v9 = vmax.f32 %v1049_v36, %v1081_v8  ;;  %1019 = vst.msk [vmem:[#allocation2 + $0x20] sm:$0xff] %vm1014_vm4, %v986_v21  ;;  %v1498_v21 = vld [vmem:[%s3163_s3 + $0x98] sm:$0xff] }
 0x162   : > { %v2115_v38 = vpop.f32.mrf.mxu0  ;;  %2184 = vmatprep.subr.mxu1 %v1498_v21  ;;  %2052 = vmatprep.subr.mxu0 %v1498_v21 }
 0x163   : > { %v1126_v22 = vmax.f32 %v1110_v37, %v1111_v9  ;;  %v859_v39 = vadd.f32 %v2115_v38, %v2778_v16  ;;  %v1482_v37 = vld [vmem:[%s3163_s3 + $0x18] sm:$0xff]  ;;  %v1497_v38 = vld [vmem:[%s3163_s3 + $0x90] sm:$0xff] }
 0x164   : > { %v853_v40 = vpop.f32.mrf.mxu0  ;;  %2200 = vmatpush3.msra.mxu1 %v1482_v37  ;;  %2053 = vmatpush3.msra.mxu0 %v1482_v37 }
 0x165   : > { %v989_v41 = vmax.f32 %v859_v39, 0.0  ;;  %v854_v42 = vadd.f32 %v2778_v16, %v853_v40  ;;  %1156 = vst.msk [vmem:[#allocation3 + $0x11] sm:$0xff] %vm1014_vm4, %v1126_v22  ;;  %2185 = vmatprep.subr.mxu1 %v1497_v38  ;;  %2054 = vmatprep.subr.mxu0 %v1497_v38 }
 0x167   : > { %1022 = vst.msk [vmem:[#allocation2 + $0x38] sm:$0xff] %vm1014_vm4, %v989_v41  ;;  %v988_v10 = vmax.f32 %v854_v42, 0.0  ;;  %v1481_v42 = vld [vmem:[%s3163_s3 + $0x10] sm:$0xff] }
 0x168   : > { %v1051_v50 = vld [vmem:[#allocation2 + $0x20] ss:$2 sm:$0xff]  ;;  %v1083_v51 = vld [vmem:[#allocation2 + $0x21] ss:$2 sm:$0xff]  ;;  %2201 = vmatpush3.msra.mxu1 %v1481_v42  ;;  %2055 = vmatpush3.msra.mxu0 %v1481_v42 }
 0x169   : > { %1021 = vst.msk [vmem:[#allocation2 + $0x30] sm:$0xff] %vm1014_vm4, %v988_v10  ;;  %v1112_v29 = vmax.f32 %v1051_v50, %v1083_v51  ;;  %v1496_v10 = vld [vmem:[%s3163_s3 + $0x88] sm:$0xff] }
 0x16a   : > { %v2118_v44 = vpop.f32.mrf.mxu0  ;;  %2186 = vmatprep.subr.mxu1 %v1496_v10  ;;  %2056 = vmatprep.subr.mxu0 %v1496_v10 }
 0x16b   : > { %v869_v45 = vadd.f32 %v2118_v44, %v2778_v16  ;;  %2202 = vmatpush3.msra.mxu1 %v1480_v43  ;;  %2057 = vmatpush3.msra.mxu0 %v1480_v43 }
 0x16c   : > { %v863_v12 = vpop.f32.mrf.mxu0  ;;  %v2876_v4 = vld [vmem:[#allocation3 + $0x11] sm:$0xff]  ;;  %2187 = vmatprep.subr.mxu1 %v1495_v11  ;;  %2058 = vmatprep.subr.mxu0 %v1495_v11 }
 0x16d   : > { %v991_v26 = vmax.f32 %v869_v45, 0.0  ;;  %v864_v49 = vadd.f32 %v2778_v16, %v863_v12  ;;  %2203 = vmatpush3.msra.mxu1 %v1479_v47  ;;  %2059 = vmatpush3.msra.mxu0 %v1479_v47 }
 0x16f   : > { %1024 = vst.msk [vmem:[#allocation2 + $0x48] sm:$0xff] %vm1014_vm4, %v991_v26  ;;  %v990_v53 = vmax.f32 %v864_v49, 0.0  ;;  %v2919_v49 = vld [vmem:[#allocation3 + $0x12] sm:$0xff] }
 0x170   : > { %v1053_v28 = vld [vmem:[#allocation2 + $0x30] ss:$2 sm:$0xff]  ;;  %v1085_v54 = vld [vmem:[#allocation2 + $0x31] ss:$2 sm:$0xff] }
 0x171   : > { %v1113_v14 = vmax.f32 %v1053_v28, %v1085_v54  ;;  %1023 = vst.msk [vmem:[#allocation2 + $0x40] sm:$0xff] %vm1014_vm4, %v990_v53 }
 0x172   : > { %v2121_v55 = vpop.f32.mrf.mxu0 }
 0x173   : > { %v1127_v30 = vmax.f32 %v1112_v29, %v1113_v14  ;;  %v879_v58 = vadd.f32 %v2121_v55, %v2778_v16 }
 0x174   : > { %v873_v59 = vpop.f32.mrf.mxu0 }
 0x175   : > { %v993_v61 = vmax.f32 %v879_v58, 0.0  ;;  %v874_v32 = vadd.f32 %v2778_v16, %v873_v59  ;;  %1157 = vst.msk [vmem:[#allocation3 + $0x21] sm:$0xff] %vm1014_vm4, %v1127_v30 }
 0x177   : > { %1026 = vst.msk [vmem:[#allocation2 + $0x58] sm:$0xff] %vm1014_vm4, %v993_v61  ;;  %v992_v62 = vmax.f32 %v874_v32, 0.0 }
 0x178   : > { %v1055_v36 = vld [vmem:[#allocation2 + $0x40] ss:$2 sm:$0xff]  ;;  %v1087_v8 = vld [vmem:[#allocation2 + $0x41] ss:$2 sm:$0xff] }
 0x179   : > { %1025 = vst.msk [vmem:[#allocation2 + $0x50] sm:$0xff] %vm1014_vm4, %v992_v62  ;;  %v1114_v23 = vmax.f32 %v1055_v36, %v1087_v8 }
 0x17a   : > { %v2124_v2 = vpop.f32.mrf.mxu0 }
 0x17b   : > { %v889_v3 = vadd.f32 %v2124_v2, %v2778_v16 }
 0x17c   : > { %v883_v5 = vpop.f32.mrf.mxu0  ;;  %v2878_v6 = vld [vmem:[#allocation3 + $0x22] sm:$0xff] }
 0x17d   : > { %v995_v34 = vmax.f32 %v889_v3, 0.0  ;;  %v884_v20 = vadd.f32 %v2778_v16, %v883_v5  ;;  %v2219_v35 = vpack.i.bf16 %v2876_v4, %v2878_v6  ;;  %v2923_v50 = vld [vmem:[#allocation3 + $0x20] sm:$0xff] }
 0x17e   : > { %v2937_v30 = vld [vmem:[#allocation3 + $0x21] sm:$0xff] }
 0x17f   : > { %1028 = vst.msk [vmem:[#allocation2 + $0x68] sm:$0xff] %vm1014_vm4, %v995_v34  ;;  %v994_v9 = vmax.f32 %v884_v20, 0.0  ;;  %2220 = vrot.lane.b32.xlu0 %v2219_v35, %s2350_s17 }
 0x180   : > { %v1057_v22 = vld [vmem:[#allocation2 + $0x50] ss:$2 sm:$0xff]  ;;  %v1089_v39 = vld [vmem:[#allocation2 + $0x51] ss:$2 sm:$0xff] }
 0x181   : > { %v1115_v40 = vmax.f32 %v1057_v22, %v1089_v39  ;;  %1027 = vst.msk [vmem:[#allocation2 + $0x60] sm:$0xff] %vm1014_vm4, %v994_v9 }
 0x182   : > { %v2127_v41 = vpop.f32.mrf.mxu0 }
 0x183   : > { %v1128_v24 = vmax.f32 %v1114_v23, %v1115_v40  ;;  %v899_v25 = vadd.f32 %v2127_v41, %v2778_v16 }
 0x184   : > { %v893_v44 = vpop.f32.mrf.mxu0 }
 0x185   : > { %v997_v45 = vmax.f32 %v899_v25, 0.0  ;;  %1158 = vst.msk [vmem:[#allocation3 + $0x31] sm:$0xff] %vm1014_vm4, %v1128_v24  ;;  %v894_v46 = vadd.f32 %v2778_v16, %v893_v44 }
 0x187   : > { %1030 = vst.msk [vmem:[#allocation2 + $0x78] sm:$0xff] %vm1014_vm4, %v997_v45  ;;  %v996_v48 = vmax.f32 %v894_v46, 0.0 }
 0x188   : > { %v1059_v29 = vld [vmem:[#allocation2 + $0x60] ss:$2 sm:$0xff]  ;;  %v1091_v14 = vld [vmem:[#allocation2 + $0x61] ss:$2 sm:$0xff] }
 0x189   : > { %1029 = vst.msk [vmem:[#allocation2 + $0x70] sm:$0xff] %vm1014_vm4, %v996_v48  ;;  %v1116_v58 = vmax.f32 %v1059_v29, %v1091_v14 }
 0x18a   : > { %v2130_v12 = vpop.f32.mrf.mxu0 }
 0x18b   : > { %v909_v26 = vadd.f32 %v2130_v12, %v2778_v16 }
 0x18c   : > { %v903_v27 = vpop.f32.mrf.mxu0  ;;  %v2921_v13 = vld [vmem:[#allocation3 + $0x30] sm:$0xff] }
 0x18d   : > { %v2925_v51 = vld [vmem:[#allocation3 + $0x31] sm:$0xff]  ;;  %v999_v52 = vmax.f32 %v909_v26, 0.0  ;;  %v904_v53 = vadd.f32 %v2778_v16, %v903_v27  ;;  %v2224_v28 = vpack.i.bf16 %v2919_v49, %v2921_v13 }
 0x18e   : > { %v2229_v54 = vpack.i.bf16 %v2923_v50, %v2925_v51  ;;  %v2932_v55 = vld [vmem:[#allocation3 + $0x32] sm:$0xff] }
 0x18f   : > { %1032 = vst.msk [vmem:[#allocation2 + $0x88] sm:$0xff] %vm1014_vm4, %v999_v52  ;;  %v998_v15 = vmax.f32 %v904_v53, 0.0  ;;  %2225 = vrot.lane.b32.xlu1 %v2224_v28, %s2351_s7  ;;  %v2234_v59 = vpack.i.bf16 %v2937_v30, %v2932_v55 }
 0x190   : > { %2230 = vrot.lane.b32.xlu0 %v2229_v54, %s2352_s8  ;;  %v1061_v56 = vld [vmem:[#allocation2 + $0x70] ss:$2 sm:$0xff]  ;;  %v1093_v57 = vld [vmem:[#allocation2 + $0x71] ss:$2 sm:$0xff] }
 0x191   : > { %v1117_v31 = vmax.f32 %v1061_v56, %v1093_v57  ;;  %1031 = vst.msk [vmem:[#allocation2 + $0x80] sm:$0xff] %vm1014_vm4, %v998_v15 }
 0x192   : > { %v2133_v60 = vpop.f32.mrf.mxu0 }
 0x193   : > { %v1129_v61 = vmax.f32 %v1116_v58, %v1117_v31  ;;  %v919_v32 = vadd.f32 %v2133_v60, %v2778_v16  ;;  %2235 = vrot.lane.b32.xlu1 %v2234_v59, %s2350_s17 }
 0x194   : > { %v913_v17 = vpop.f32.mrf.mxu0 }
 0x195   : > { %1159 = vst.msk [vmem:[#allocation3 + $0x41] sm:$0xff] %vm1014_vm4, %v1129_v61  ;;  %v1001_v33 = vmax.f32 %v919_v32, 0.0  ;;  %v914_v62 = vadd.f32 %v2778_v16, %v913_v17 }
 0x197   : > { %1034 = vst.msk [vmem:[#allocation2 + $0x98] sm:$0xff] %vm1014_vm4, %v1001_v33  ;;  %v1000_v63 = vmax.f32 %v914_v62, 0.0 }
 0x198   : > { %v1063_v20 = vld [vmem:[#allocation2 + $0x80] ss:$2 sm:$0xff]  ;;  %v1095_v35 = vld [vmem:[#allocation2 + $0x81] ss:$2 sm:$0xff] }
 0x199   : > { %1033 = vst.msk [vmem:[#allocation2 + $0x90] sm:$0xff] %vm1014_vm4, %v1000_v63  ;;  %v1118_v9 = vmax.f32 %v1063_v20, %v1095_v35 }
 0x19a   : > { %v2136_v0 = vpop.f32.mrf.mxu0 }
 0x19b   : > { %v929_v1 = vadd.f32 %v2136_v0, %v2778_v16 }
 0x19c   : > { %v923_v2 = vpop.f32.mrf.mxu0  ;;  %v2949_v18 = vld [vmem:[#allocation3 + $0x41] sm:$0xff] }
 0x19d   : > { %v2951_v3 = vld [vmem:[#allocation3 + $0x40] sm:$0xff]  ;;  %v1003_v19 = vmax.f32 %v929_v1, 0.0  ;;  %v924_v5 = vadd.f32 %v2778_v16, %v923_v2  ;;  %v2244_v7 = vpack.i.bf16 %v2921_v13, %v2949_v18 }
 0x19e   : > { %v2239_v34 = vpack.i.bf16 %v2878_v6, %v2951_v3  ;;  %v2958_v21 = vld [vmem:[#allocation3 + $0x42] sm:$0xff] }
 0x19f   : > { %1036 = vst.msk [vmem:[#allocation2 + $0xa8] sm:$0xff] %vm1014_vm4, %v1003_v19  ;;  %v1002_v36 = vmax.f32 %v924_v5, 0.0  ;;  %2245 = vrot.lane.b32.xlu1 %v2244_v7, %s2352_s8  ;;  %v2249_v22 = vpack.i.bf16 %v2925_v51, %v2958_v21 }
 0x1a0   : > { %2240 = vrot.lane.b32.xlu0 %v2239_v34, %s2351_s7  ;;  %v1065_v8 = vld [vmem:[#allocation2 + $0x90] ss:$2 sm:$0xff]  ;;  %v1097_v37 = vld [vmem:[#allocation2 + $0x91] ss:$2 sm:$0xff] }
 0x1a1   : > { %v1119_v38 = vmax.f32 %v1065_v8, %v1097_v37  ;;  %1035 = vst.msk [vmem:[#allocation2 + $0xa0] sm:$0xff] %vm1014_vm4, %v1002_v36 }
 0x1a2   : > { %v2139_v39 = vpop.f32.mrf.mxu0 }
 0x1a3   : > { %v1130_v23 = vmax.f32 %v1118_v9, %v1119_v38  ;;  %v939_v40 = vadd.f32 %v2139_v39, %v2778_v16 }
 0x1a4   : > { %2250 = vrot.lane.b32.xlu0 %v2249_v22, %s2350_s17  ;;  %v933_v41 = vpop.f32.mrf.mxu0  ;;  %v3017_v22 = vld [vmem:[%s3163_s3 + $0x118] sm:$0xff] }
 0x1a5   : > { %1160 = vst.msk [vmem:[#allocation3 + $0x51] sm:$0xff] %vm1014_vm4, %v1130_v23  ;;  %v1005_v42 = vmax.f32 %v939_v40, 0.0  ;;  %v934_v10 = vadd.f32 %v2778_v16, %v933_v41  ;;  %2152 = vmatprep.subr.mxu1 %v3017_v22 }
 0x1a7   : > { %1038 = vst.msk [vmem:[#allocation2 + $0xb8] sm:$0xff] %vm1014_vm4, %v1005_v42  ;;  %v1004_v43 = vmax.f32 %v934_v10, 0.0 }
 0x1a8   : > { %v1067_v26 = vld [vmem:[#allocation2 + $0xa0] ss:$2 sm:$0xff]  ;;  %v1099_v27 = vld [vmem:[#allocation2 + $0xa1] ss:$2 sm:$0xff] }
 0x1a9   : > { %1037 = vst.msk [vmem:[#allocation2 + $0xb0] sm:$0xff] %vm1014_vm4, %v1004_v43  ;;  %v1120_v29 = vmax.f32 %v1067_v26, %v1099_v27 }
 0x1aa   : > { %v2142_v24 = vpop.f32.mrf.mxu0 }
 0x1ab   : > { %v949_v25 = vadd.f32 %v2142_v24, %v2778_v16 }
 0x1ac   : > { %v943_v11 = vpop.f32.mrf.mxu0  ;;  %v2973_v44 = vld [vmem:[#allocation3 + $0x50] sm:$0xff] }
 0x1ad   : > { %v2975_v45 = vld [vmem:[#allocation3 + $0x51] sm:$0xff]  ;;  %v1007_v46 = vmax.f32 %v949_v25, 0.0  ;;  %v944_v47 = vadd.f32 %v2778_v16, %v943_v11  ;;  %v2254_v48 = vpack.i.bf16 %v2932_v55, %v2973_v44 }
 0x1ae   : > { %v2259_v12 = vpack.i.bf16 %v2951_v3, %v2975_v45  ;;  %v2982_v52 = vld [vmem:[#allocation3 + $0x52] sm:$0xff] }
 0x1af   : > { %1040 = vst.msk [vmem:[#allocation2 + $0xc8] sm:$0xff] %vm1014_vm4, %v1007_v46  ;;  %v1006_v53 = vmax.f32 %v944_v47, 0.0  ;;  %2255 = vrot.lane.b32.xlu1 %v2254_v48, %s2351_s7  ;;  %v2264_v15 = vpack.i.bf16 %v2949_v18, %v2982_v52 }
 0x1b0   : > { %2260 = vrot.lane.b32.xlu0 %v2259_v12, %s2352_s8  ;;  %v1069_v28 = vld [vmem:[#allocation2 + $0xb0] ss:$2 sm:$0xff]  ;;  %v1101_v54 = vld [vmem:[#allocation2 + $0xb1] ss:$2 sm:$0xff] }
 0x1b1   : > { %v1121_v14 = vmax.f32 %v1069_v28, %v1101_v54  ;;  %1039 = vst.msk [vmem:[#allocation2 + $0xc0] sm:$0xff] %vm1014_vm4, %v1006_v53 }
 0x1b2   : > { %v2145_v56 = vpop.f32.mrf.mxu0 }
 0x1b3   : > { %v1131_v57 = vmax.f32 %v1120_v29, %v1121_v14  ;;  %v959_v58 = vadd.f32 %v2145_v56, %v2778_v16  ;;  %2265 = vrot.lane.b32.xlu1 %v2264_v15, %s2350_s17  ;;  %v1220_v56 = vld [vmem:[#allocation3 + $0x90] sm:$0xff] }
 0x1b4   : > { %v953_v31 = vpop.f32.mrf.mxu0 }
 0x1b5   : > { %1161 = vst.msk [vmem:[#allocation3 + $0x61] sm:$0xff] %vm1014_vm4, %v1131_v57  ;;  %v1009_v59 = vmax.f32 %v959_v58, 0.0  ;;  %v954_v60 = vadd.f32 %v2778_v16, %v953_v31 }
 0x1b7   : > { %1042 = vst.msk [vmem:[#allocation2 + $0xd8] sm:$0xff] %vm1014_vm4, %v1009_v59  ;;  %v1008_v61 = vmax.f32 %v954_v60, 0.0  ;;  %v1172_v59 = vld [vmem:[#allocation3 + $0x1] sm:$0xff]  ;;  %v1228_v60 = vld [vmem:[#allocation3 + $0x91] sm:$0xff] }
 0x1b8   : > { %v1071_v5 = vld [vmem:[#allocation2 + $0xc0] ss:$2 sm:$0xff]  ;;  %v1103_v7 = vld [vmem:[#allocation2 + $0xc1] ss:$2 sm:$0xff] }
 0x1b9   : > { %1041 = vst.msk [vmem:[#allocation2 + $0xd0] sm:$0xff] %vm1014_vm4, %v1008_v61  ;;  %v1122_v8 = vmax.f32 %v1071_v5, %v1103_v7  ;;  %v2324_v61 = vpack.i.bf16 %v1172_v59, %v2919_v49 }
 0x1ba   : > { %v2148_v32 = vpop.f32.mrf.mxu0 }
 0x1bb   : > { %v969_v17 = vadd.f32 %v2148_v32, %v2778_v16 }
 0x1bc   : > { %v963_v33 = vpop.f32.mrf.mxu0  ;;  %v2997_v62 = vld [vmem:[#allocation3 + $0x61] sm:$0xff] }
 0x1bd   : > { %v2999_v63 = vld [vmem:[#allocation3 + $0x60] sm:$0xff]  ;;  %v1011_v0 = vmax.f32 %v969_v17, 0.0  ;;  %v964_v1 = vadd.f32 %v2778_v16, %v963_v33  ;;  %v2274_v2 = vpack.i.bf16 %v2973_v44, %v2997_v62  ;;  %v1188_v33 = vld [vmem:[#allocation3 + $0x10] sm:$0xff] }
 0x1be   : > { %v2269_v19 = vpack.i.bf16 %v2958_v21, %v2999_v63  ;;  %v3006_v34 = vld [vmem:[#allocation3 + $0x62] sm:$0xff] }
 0x1bf   : > { %1044 = vst.msk [vmem:[#allocation2 + $0xe8] sm:$0xff] %vm1014_vm4, %v1011_v0  ;;  %v1010_v20 = vmax.f32 %v964_v1, 0.0  ;;  %2275 = vrot.lane.b32.xlu1 %v2274_v2, %s2352_s8  ;;  %v2279_v9 = vpack.i.bf16 %v2975_v45, %v3006_v34  ;;  %v1180_v17 = vld [vmem:[#allocation3 + $0x2] sm:$0xff]  ;;  %v2334_v0 = vpack.i.bf16 %v1188_v33, %v2937_v30 }
 0x1c0   : > { %2270 = vrot.lane.b32.xlu0 %v2269_v19, %s2351_s7  ;;  %v1073_v35 = vld [vmem:[#allocation2 + $0xd0] ss:$2 sm:$0xff]  ;;  %v1105_v36 = vld [vmem:[#allocation2 + $0xd1] ss:$2 sm:$0xff]  ;;  %v2329_v1 = vpack.i.bf16 %v1180_v17, %v2923_v50 }
 0x1c1   : > { %v1123_v37 = vmax.f32 %v1073_v35, %v1105_v36  ;;  %1043 = vst.msk [vmem:[#allocation2 + $0xe0] sm:$0xff] %vm1014_vm4, %v1010_v20 }
 0x1c2   : > { %v2151_v38 = vpop.f32.mrf.mxu0 }
 0x1c3   : > { %v1132_v39 = vmax.f32 %v1122_v8, %v1123_v37  ;;  %v979_v23 = vadd.f32 %v2151_v38, %v2778_v16 }
 0x1c4   : > { %2280 = vrot.lane.b32.xlu0 %v2279_v9, %s2350_s17  ;;  %v973_v40 = vpop.f32.mrf.mxu0 }
 0x1c5   : > { %1162 = vst.msk [vmem:[#allocation3 + $0x71] sm:$0xff] %vm1014_vm4, %v1132_v39  ;;  %v1013_v41 = vmax.f32 %v979_v23, 0.0  ;;  %v974_v42 = vadd.f32 %v2778_v16, %v973_v40 }
 0x1c7   : > { %1046 = vst.msk [vmem:[#allocation2 + $0xf8] sm:$0xff] %vm1014_vm4, %v1013_v41  ;;  %v1012_v10 = vmax.f32 %v974_v42, 0.0  ;;  %v1513_v41 = vld [vmem:[%s3163_s3 + $0x110] sm:$0xff]  ;;  %v1511_v42 = vld [vmem:[%s3163_s3 + $0x100] sm:$0xff] }
 0x1c8   : > { %v1075_v46 = vld [vmem:[#allocation2 + $0xe0] ss:$2 sm:$0xff]  ;;  %v1107_v47 = vld [vmem:[#allocation2 + $0xe1] ss:$2 sm:$0xff] }
 0x1c9   : > { %1045 = vst.msk [vmem:[#allocation2 + $0xf0] sm:$0xff] %vm1014_vm4, %v1012_v10  ;;  %v1124_v26 = vmax.f32 %v1075_v46, %v1107_v47 }
 0x1cc   : > { %v3026_v43 = vld [vmem:[#allocation3 + $0x70] sm:$0xff] }
 0x1cd   : > { %v3028_v24 = vld [vmem:[#allocation3 + $0x71] sm:$0xff]  ;;  %v2284_v25 = vpack.i.bf16 %v2982_v52, %v3026_v43 }
 0x1ce   : > { %v2289_v11 = vpack.i.bf16 %v2999_v63, %v3028_v24  ;;  %v3034_v48 = vld [vmem:[#allocation3 + $0x72] sm:$0xff] }
 0x1cf   : > { %2285 = vrot.lane.b32.xlu1 %v2284_v25, %s2351_s7  ;;  %v2294_v53 = vpack.i.bf16 %v2997_v62, %v3034_v48  ;;  %v2309_v58 = vpack.i.bf16 %v3034_v48, %v1220_v56 }
 0x1d0   : > { %2290 = vrot.lane.b32.xlu0 %v2289_v11, %s2352_s8  ;;  %v1077_v16 = vld [vmem:[#allocation2 + $0xf0] ss:$2 sm:$0xff]  ;;  %v1109_v12 = vld [vmem:[#allocation2 + $0xf1] ss:$2 sm:$0xff] }
 0x1d1   : > { %v1125_v27 = vmax.f32 %v1077_v16, %v1109_v12 }
 0x1d3   : > { %v1133_v28 = vmax.f32 %v1124_v26, %v1125_v27  ;;  %2295 = vrot.lane.b32.xlu1 %v2294_v53, %s2350_s17 }
 0x1d5   : > { %1163 = vst.msk [vmem:[#allocation3 + $0x81] sm:$0xff] %vm1014_vm4, %v1133_v28 }
 0x1dc   : > { %v3042_v54 = vld [vmem:[#allocation3 + $0x81] sm:$0xff] }
 0x1dd   : > { %v1219_v29 = vld [vmem:[#allocation3 + $0x80] sm:$0xff]  ;;  %v2304_v14 = vpack.i.bf16 %v3026_v43, %v3042_v54 }
 0x1de   : > { %v2299_v15 = vpack.i.bf16 %v3006_v34, %v1219_v29  ;;  %v3047_v57 = vld [vmem:[#allocation3 + $0x82] sm:$0xff]  ;;  %v2319_v32 = vpack.i.bf16 %v1219_v29, %v1228_v60 }
 0x1df   : > { %2305 = vrot.lane.b32.xlu1 %v2304_v14, %s2352_s8  ;;  %v2314_v31 = vpack.i.bf16 %v3028_v24, %v3047_v57 }
 0x1e0   : > { %2300 = vrot.lane.b32.xlu0 %v2299_v15, %s2351_s7 }
 0x1e3   : > { %2310 = vrot.lane.b32.xlu1 %v2309_v58, %s2351_s7 }
 0x1e4   : > { %2315 = vrot.lane.b32.xlu0 %v2314_v31, %s2350_s17 }
 0x1e7   : > { %2325 = vrot.lane.b32.xlu1 %v2324_v61, %s2350_s17 }
 0x1e8   : > { %2320 = vrot.lane.b32.xlu0 %v2319_v32, %s2352_s8 }
 0x1eb   : > { %2335 = vrot.lane.b32.xlu1 %v2334_v0, %s2352_s8 }
 0x1ec   : > { %2330 = vrot.lane.b32.xlu0 %v2329_v1, %s2351_s7 }
 0x1f1   : > { %v2221_v2 = vpop.permute.xlu0 %2220 }
 0x1f2   : > { %v2223_v19 = vunpack.i.h.bf16 %v2221_v2  ;;  %v2222_v5 = vunpack.i.l.bf16 %v2221_v2 }
 0x1f4   : > { %v1456_v37 = vsel %vm1014_vm4, %v2937_v30, %v2222_v5  ;;  %v1430_v9 = vsel %vm1014_vm4, %v1188_v33, %v2223_v19  ;;  %v1512_v30 = vld [vmem:[%s3163_s3 + $0x108] sm:$0xff] }
 0x201   : > { %v2226_v7 = vpop.permute.xlu1 %2225 }
 0x202   : > { %v2231_v49 = vpop.permute.xlu0 %2230  ;;  %v2228_v20 = vunpack.i.h.bf16 %v2226_v7  ;;  %v2227_v35 = vunpack.i.l.bf16 %v2226_v7 }
 0x203   : > { %v2233_v36 = vunpack.i.h.bf16 %v2231_v49  ;;  %v2232_v8 = vunpack.i.l.bf16 %v2231_v49 }
 0x204   : > { %v1464_v38 = vsel %vm1437_vm6, %v1456_v37, %v2227_v35  ;;  %v1439_v39 = vsel %vm1437_vm6, %v1430_v9, %v2228_v20 }
 0x205   : > { %v1472_v23 = vsel %vm1446_vm7, %v1464_v38, %v2232_v8  ;;  %v1448_v40 = vsel %vm1446_vm7, %v1439_v39, %v2233_v36  ;;  %v2236_v10 = vpop.permute.xlu1 %2235 }
 0x206   : > { %1615 = vmatprep.mubr.f32.mxu1 %v1472_v23  ;;  %v2238_v25 = vunpack.i.h.bf16 %v2236_v10  ;;  %v2237_v11 = vunpack.i.l.bf16 %v2236_v10 }
 0x207   : > { %1616 = vmatmul.mubr.f32.vlgmr.msra.gmra.mxu1 %v1448_v40 }
 0x208   : > { %2153 = vmatpush3.msra.mxu1 %v3017_v22  ;;  %v1457_v27 = vsel %vm1014_vm4, %v2925_v51, %v2237_v11  ;;  %v1431_v53 = vsel %vm1014_vm4, %v2923_v50, %v2238_v25 }
 0x209   : > { %2154 = vmatprep.subr.mxu1 %v1513_v41 }
 0x20a   : > { %2155 = vmatpush3.msra.mxu1 %v1513_v41 }
 0x20b   : > { %2156 = vmatprep.subr.mxu1 %v1512_v30 }
 0x20c   : > { %2157 = vmatpush3.msra.mxu1 %v1512_v30 }
 0x20d   : > { %2158 = vmatprep.subr.mxu1 %v1511_v42 }
 0x20e   : > { %2159 = vmatpush3.msra.mxu1 %v1511_v42 }
 0x211   : > { %v2246_v46 = vpop.permute.xlu1 %2245 }
 0x212   : > { %v2241_v47 = vpop.permute.xlu0 %2240  ;;  %v2248_v22 = vunpack.i.h.bf16 %v2246_v46  ;;  %v2247_v16 = vunpack.i.l.bf16 %v2246_v46 }
 0x213   : > { %v2243_v12 = vunpack.i.h.bf16 %v2241_v47  ;;  %v2242_v26 = vunpack.i.l.bf16 %v2241_v47 }
 0x215   : > { %v1465_v28 = vsel %vm1437_vm6, %v1457_v27, %v2242_v26  ;;  %v1440_v29 = vsel %vm1437_vm6, %v1431_v53, %v2243_v12 }
 0x216   : > { %v1473_v14 = vsel %vm1446_vm7, %v1465_v28, %v2247_v16  ;;  %v1449_v15 = vsel %vm1446_vm7, %v1440_v29, %v2248_v22  ;;  %v2251_v56 = vpop.permute.xlu0 %2250 }
 0x217   : > { %1620 = vmatprep.mubr.f32.mxu1 %v1473_v14  ;;  %v2253_v58 = vunpack.i.h.bf16 %v2251_v56  ;;  %v2252_v31 = vunpack.i.l.bf16 %v2251_v56 }
 0x218   : > { %1621 = vmatmul.mubr.f32.gmra.mxu1 %v1449_v15 }
 0x219   : > { %v1458_v50 = vsel %vm1014_vm4, %v2949_v18, %v2252_v31  ;;  %v1432_v33 = vsel %vm1014_vm4, %v2921_v13, %v2253_v58 }
 0x221   : > { %v2256_v59 = vpop.permute.xlu1 %2255 }
 0x222   : > { %v2261_v60 = vpop.permute.xlu0 %2260  ;;  %v2258_v61 = vunpack.i.h.bf16 %v2256_v59  ;;  %v2257_v51 = vunpack.i.l.bf16 %v2256_v59 }
 0x223   : > { %v2263_v32 = vunpack.i.h.bf16 %v2261_v60  ;;  %v2262_v17 = vunpack.i.l.bf16 %v2261_v60 }
 0x224   : > { %v1466_v0 = vsel %vm1437_vm6, %v1458_v50, %v2257_v51  ;;  %v1441_v1 = vsel %vm1437_vm6, %v1432_v33, %v2258_v61 }
 0x225   : > { %v1474_v2 = vsel %vm1446_vm7, %v1466_v0, %v2262_v17  ;;  %v1450_v19 = vsel %vm1446_vm7, %v1441_v1, %v2263_v32  ;;  %v2266_v5 = vpop.permute.xlu1 %2265 }
 0x226   : > { %1625 = vmatprep.mubr.f32.mxu1 %v1474_v2  ;;  %v2268_v7 = vunpack.i.h.bf16 %v2266_v5  ;;  %v2267_v49 = vunpack.i.l.bf16 %v2266_v5 }
 0x227   : > { %1626 = vmatmul.mubr.f32.gmra.mxu1 %v1450_v19 }
 0x228   : > { %v1459_v13 = vsel %vm1014_vm4, %v2975_v45, %v2267_v49  ;;  %v1433_v9 = vsel %vm1014_vm4, %v2951_v3, %v2268_v7 }
 0x231   : > { %v2276_v20 = vpop.permute.xlu1 %2275 }
 0x232   : > { %v2271_v35 = vpop.permute.xlu0 %2270  ;;  %v2278_v36 = vunpack.i.h.bf16 %v2276_v20  ;;  %v2277_v18 = vunpack.i.l.bf16 %v2276_v20 }
 0x233   : > { %v2273_v8 = vunpack.i.h.bf16 %v2271_v35  ;;  %v2272_v37 = vunpack.i.l.bf16 %v2271_v35 }
 0x235   : > { %v1467_v38 = vsel %vm1437_vm6, %v1459_v13, %v2272_v37  ;;  %v1442_v39 = vsel %vm1437_vm6, %v1433_v9, %v2273_v8  ;;  %v1164_v8 = vld [vmem:[#allocation3] sm:$0xff] }
 0x236   : > { %v1475_v23 = vsel %vm1446_vm7, %v1467_v38, %v2277_v18  ;;  %v1451_v40 = vsel %vm1446_vm7, %v1442_v39, %v2278_v36  ;;  %v2281_v41 = vpop.permute.xlu0 %2280 }
 0x237   : > { %1630 = vmatprep.mubr.f32.mxu1 %v1475_v23  ;;  %v2283_v30 = vunpack.i.h.bf16 %v2281_v41  ;;  %v2282_v42 = vunpack.i.l.bf16 %v2281_v41 }
 0x238   : > { %1631 = vmatmul.mubr.f32.gmra.mxu1 %v1451_v40 }
 0x239   : > { %v1460_v3 = vsel %vm1014_vm4, %v2997_v62, %v2282_v42  ;;  %v1434_v22 = vsel %vm1014_vm4, %v2973_v44, %v2283_v30 }
 0x241   : > { %v2286_v10 = vpop.permute.xlu1 %2285 }
 0x242   : > { %v2291_v25 = vpop.permute.xlu0 %2290  ;;  %v2288_v11 = vunpack.i.h.bf16 %v2286_v10  ;;  %v2287_v45 = vunpack.i.l.bf16 %v2286_v10 }
 0x243   : > { %v2293_v46 = vunpack.i.h.bf16 %v2291_v25  ;;  %v2292_v47 = vunpack.i.l.bf16 %v2291_v25 }
 0x244   : > { %v1468_v16 = vsel %vm1437_vm6, %v1460_v3, %v2287_v45  ;;  %v1443_v12 = vsel %vm1437_vm6, %v1434_v22, %v2288_v11 }
 0x245   : > { %v1476_v26 = vsel %vm1446_vm7, %v1468_v16, %v2292_v47  ;;  %v1452_v27 = vsel %vm1446_vm7, %v1443_v12, %v2293_v46  ;;  %v2296_v53 = vpop.permute.xlu1 %2295 }
 0x246   : > { %1635 = vmatprep.mubr.f32.mxu1 %v1476_v26  ;;  %v2298_v28 = vunpack.i.h.bf16 %v2296_v53  ;;  %v2297_v29 = vunpack.i.l.bf16 %v2296_v53 }
 0x247   : > { %1636 = vmatmul.mubr.f32.gmra.mxu1 %v1452_v27 }
 0x248   : > { %v1461_v44 = vsel %vm1014_vm4, %v3028_v24, %v2297_v29  ;;  %v1435_v59 = vsel %vm1014_vm4, %v2999_v63, %v2298_v28 }
 0x251   : > { %v2306_v14 = vpop.permute.xlu1 %2305 }
 0x252   : > { %v2301_v15 = vpop.permute.xlu0 %2300  ;;  %v2308_v56 = vunpack.i.h.bf16 %v2306_v14  ;;  %v2307_v62 = vunpack.i.l.bf16 %v2306_v14 }
 0x253   : > { %v2303_v58 = vunpack.i.h.bf16 %v2301_v15  ;;  %v2302_v31 = vunpack.i.l.bf16 %v2301_v15 }
 0x255   : > { %v1469_v60 = vsel %vm1437_vm6, %v1461_v44, %v2302_v31  ;;  %v1444_v61 = vsel %vm1437_vm6, %v1435_v59, %v2303_v58  ;;  %v2311_v51 = vpop.permute.xlu1 %2310 }
 0x256   : > { %v2316_v32 = vpop.permute.xlu0 %2315  ;;  %v1477_v17 = vsel %vm1446_vm7, %v1469_v60, %v2307_v62  ;;  %v1453_v50 = vsel %vm1446_vm7, %v1444_v61, %v2308_v56  ;;  %v2313_v1 = vunpack.i.h.bf16 %v2311_v51  ;;  %v2312_v2 = vunpack.i.l.bf16 %v2311_v51 }
 0x257   : > { %v2318_v33 = vunpack.i.h.bf16 %v2316_v32  ;;  %v2317_v0 = vunpack.i.l.bf16 %v2316_v32  ;;  %1640 = vmatprep.mubr.f32.mxu1 %v1477_v17 }
 0x258   : > { %1641 = vmatmul.mubr.f32.gmra.mxu1 %v1453_v50 }
 0x259   : > { %v1462_v24 = vsel %vm1014_vm4, %v3042_v54, %v2317_v0  ;;  %v1436_v63 = vsel %vm1014_vm4, %v3026_v43, %v2318_v33  ;;  %v2326_v19 = vpop.permute.xlu1 %2325 }
 0x25a   : > { %v2321_v5 = vpop.permute.xlu0 %2320  ;;  %v2328_v20 = vunpack.i.h.bf16 %v2326_v19  ;;  %v2327_v35 = vunpack.i.l.bf16 %v2326_v19  ;;  %v1470_v36 = vsel %vm1437_vm6, %v1462_v24, %v2312_v2  ;;  %v1445_v18 = vsel %vm1437_vm6, %v1436_v63, %v2313_v1 }
 0x25b   : > { %v2323_v7 = vunpack.i.h.bf16 %v2321_v5  ;;  %v2322_v49 = vunpack.i.l.bf16 %v2321_v5 }
 0x25c   : > { %v1429_v40 = vsel %vm1014_vm4, %v1164_v8, %v2328_v20  ;;  %v1455_v41 = vsel %vm1014_vm4, %v2876_v4, %v2327_v35  ;;  %v1236_v4 = vld [vmem:[#allocation3 + $0x92] sm:$0xff] }
 0x25d   : > { %v1478_v37 = vsel %vm1446_vm7, %v1470_v36, %v2322_v49  ;;  %v1454_v13 = vsel %vm1446_vm7, %v1445_v18, %v2323_v7  ;;  %v2336_v9 = vpop.permute.xlu1 %2335 }
 0x25e   : > { %v2331_v54 = vpop.permute.xlu0 %2330  ;;  %1645 = vmatprep.mubr.f32.mxu1 %v1478_v37  ;;  %v2338_v38 = vunpack.i.h.bf16 %v2336_v9  ;;  %v2337_v43 = vunpack.i.l.bf16 %v2336_v9 }
 0x25f   : > { %v2333_v39 = vunpack.i.h.bf16 %v2331_v54  ;;  %v2332_v23 = vunpack.i.l.bf16 %v2331_v54  ;;  %1646 = vmatmul.mubr.f32.gmra.mxu1 %v1454_v13 }
 0x260   : > { %2160 = vmatprep.mubr.msk.f32.mxu1 %vm1014_vm4, %v2878_v6 }
 0x261   : > { %v1438_v30 = vsel %vm1437_vm6, %v1429_v40, %v2333_v39  ;;  %v1463_v42 = vsel %vm1437_vm6, %v1455_v41, %v2332_v23 }
 0x262   : > { %v1471_v10 = vsel %vm1446_vm7, %v1463_v42, %v2337_v43  ;;  %v1447_v25 = vsel %vm1446_vm7, %v1438_v30, %v2338_v38 }
 0x263   : > { %1610 = vmatprep.mubr.f32.mxu0 %v1471_v10  ;;  %2161 = vmatmul.mubr.msk.f32.vlgmr.msra.gmra.mxu1 %vm1014_vm4, %v2932_v55 }
 0x264   : > { %1611 = vmatmul.mubr.f32.vlgmr.msra.gmra.mxu0 %v1447_v25  ;;  %2163 = vmatprep.mubr.msk.f32.mxu1 %vm1014_vm4, %v2958_v21 }
 0x267   : > { %2164 = vmatmul.mubr.msk.f32.gmra.mxu1 %vm1014_vm4, %v2982_v52 }
 0x268   : > { %2166 = vmatprep.mubr.msk.f32.mxu1 %vm1014_vm4, %v3006_v34 }
 0x26b   : > { %2167 = vmatmul.mubr.msk.f32.gmra.mxu1 %vm1014_vm4, %v3034_v48 }
 0x26c   : > { %2169 = vmatprep.mubr.msk.f32.mxu1 %vm1014_vm4, %v3047_v57  ;;  %v1980_v57 = vld [vmem:[%s3164_s4] ss:$0 sm:$0xff] }
 0x26f   : > { %2170 = vmatmul.mubr.msk.f32.gmra.mxu1 %vm1014_vm4, %v1236_v4 }
 0x2c7   : > { %v2063_v6 = vpop.f32.mrf.mxu1 }
 0x2c9   : > { %v2064_v55 = vpop.f32.mrf.mxu1 }
 0x2ca   : > { %v2065_v12 = vadd.f32 %v2064_v55, %v2063_v6 }
 0x2cc   : > { %v1618_v53 = vadd.f32 %v2065_v12, %v1980_v57 }
 0x2d8   : > { %v2066_v11 = vpop.f32.mrf.mxu1 }
 0x2da   : > { %v2067_v45 = vpop.f32.mrf.mxu1 }
 0x2db   : > { %v2068_v29 = vadd.f32 %v2067_v45, %v2066_v11 }
 0x2dd   : > { %v1623_v32 = vadd.f32 %v2068_v29, %v1980_v57 }
 0x2e7   : > { %v2069_v21 = vpop.f32.mrf.mxu1 }
 0x2e9   : > { %v2070_v46 = vpop.f32.mrf.mxu1 }
 0x2ea   : > { %v2071_v27 = vadd.f32 %v2070_v46, %v2069_v21 }
 0x2ec   : > { %v1628_v44 = vadd.f32 %v2071_v27, %v1980_v57 }
 0x2f8   : > { %v2072_v47 = vpop.f32.mrf.mxu1 }
 0x2fa   : > { %v2073_v52 = vpop.f32.mrf.mxu1 }
 0x2fb   : > { %v2074_v61 = vadd.f32 %v2073_v52, %v2072_v47 }
 0x2fd   : > { %v1633_v49 = vadd.f32 %v2074_v61, %v1980_v57 }
 0x307   : > { %v2075_v3 = vpop.f32.mrf.mxu1 }
 0x309   : > { %v2076_v22 = vpop.f32.mrf.mxu1 }
 0x30a   : > { %v2077_v62 = vadd.f32 %v2076_v22, %v2075_v3 }
 0x30c   : > { %v1638_v2 = vadd.f32 %v2077_v62, %v1980_v57 }
 0x318   : > { %v2078_v34 = vpop.f32.mrf.mxu1 }
 0x31a   : > { %v2079_v16 = vpop.f32.mrf.mxu1 }
 0x31b   : > { %v2080_v19 = vadd.f32 %v2079_v16, %v2078_v34 }
 0x31d   : > { %v1643_v54 = vadd.f32 %v2080_v19, %v1980_v57 }
 0x31f   : > { %v2081_v48 = vpop.f32.mrf.mxu1 }
 0x321   : > { %v2082_v26 = vpop.f32.mrf.mxu1 }
 0x322   : > { %v2083_v33 = vadd.f32 %v2082_v26, %v2081_v48 }
 0x323   : > { %v2162_v28 = vpop.f32.mrf.mxu1 }
 0x324   : > { %v1723_v14 = vadd.f32 %v2162_v28, %v1618_v53  ;;  %v2060_v15 = vpop.f32.mrf.mxu0  ;;  %v1648_v8 = vadd.f32 %v2083_v33, %v1980_v57 }
 0x325   : > { %v1717_v56 = vpop.f32.mrf.mxu1 }
 0x326   : > { %v1757_v58 = vmax.f32 %v1723_v14, 0.0  ;;  %v2061_v31 = vpop.f32.mrf.mxu0 }
 0x327   : > { %v2062_v59 = vadd.f32 %v2061_v31, %v2060_v15  ;;  %v2165_v60 = vpop.f32.mrf.mxu1 }
 0x328   : > { %1765 = vst [vmem:[#allocation4 + $0x8] sm:$0xff] %v1757_v58  ;;  %v1733_v51 = vadd.f32 %v2165_v60, %v1628_v44 }
 0x329   : > { %v1613_v17 = vadd.f32 %v2062_v59, %v1980_v57  ;;  %v1727_v50 = vpop.f32.mrf.mxu1 }
 0x32a   : > { %v1759_v0 = vmax.f32 %v1733_v51, 0.0  ;;  %v1728_v1 = vadd.f32 %v1727_v50, %v1623_v32 }
 0x32b   : > { %v1718_v24 = vadd.f32 %v1717_v56, %v1613_v17  ;;  %v2168_v63 = vpop.f32.mrf.mxu1 }
 0x32c   : > { %1767 = vst [vmem:[#allocation4 + $0x18] sm:$0xff] %v1759_v0  ;;  %v1758_v5 = vmax.f32 %v1728_v1, 0.0  ;;  %v1743_v7 = vadd.f32 %v2168_v63, %v1638_v2 }
 0x32d   : > { %v1756_v20 = vmax.f32 %v1718_v24, 0.0  ;;  %v1737_v35 = vpop.f32.mrf.mxu1 }
 0x32e   : > { %1766 = vst [vmem:[#allocation4 + $0x10] sm:$0xff] %v1758_v5  ;;  %v1761_v36 = vmax.f32 %v1743_v7, 0.0  ;;  %v1738_v18 = vadd.f32 %v1737_v35, %v1633_v49 }
 0x32f   : > { %1764 = vst [vmem:[#allocation4] sm:$0xff] %v1756_v20  ;;  %v2171_v37 = vpop.f32.mrf.mxu1  ;;  %v1774_v43 = vld [vmem:[#allocation4 + $0x8] ss:$2 sm:$0xf] }
 0x330   : > { %1769 = vst [vmem:[#allocation4 + $0x28] sm:$0xff] %v1761_v36  ;;  %v1760_v13 = vmax.f32 %v1738_v18, 0.0  ;;  %v1753_v9 = vadd.f32 %v2171_v37, %v1648_v8  ;;  %v1790_v30 = vld [vmem:[#allocation4 + $0x9] ss:$2 sm:$0xf] }
 0x331   : > { %v1747_v38 = vpop.f32.mrf.mxu1  ;;  %v1804_v45 = vmax.f32 %v1774_v43, %v1790_v30 }
 0x332   : > { %1768 = vst [vmem:[#allocation4 + $0x20] sm:$0xff] %v1760_v13  ;;  %v1763_v39 = vmax.f32 %v1753_v9, 0.0  ;;  %v1748_v23 = vadd.f32 %v1747_v38, %v1643_v54 }
 0x333   : > { %v1778_v40 = vld [vmem:[#allocation4 + $0x18] ss:$2 sm:$0xf]  ;;  %v1794_v41 = vld [vmem:[#allocation4 + $0x19] ss:$2 sm:$0xf] }
 0x334   : > { %1771 = vst [vmem:[#allocation4 + $0x38] sm:$0xff] %v1763_v39  ;;  %v1762_v42 = vmax.f32 %v1748_v23, 0.0  ;;  %v1806_v55 = vmax.f32 %v1778_v40, %v1794_v41 }
 0x335   : > { %v1776_v10 = vld [vmem:[#allocation4 + $0x10] ss:$2 sm:$0xf]  ;;  %v1792_v25 = vld [vmem:[#allocation4 + $0x11] ss:$2 sm:$0xf] }
 0x336   : > { %v1772_v4 = vld [vmem:[#allocation4] ss:$2 sm:$0xf]  ;;  %v1788_v6 = vld [vmem:[#allocation4 + $0x1] ss:$2 sm:$0xf]  ;;  %v1805_v11 = vmax.f32 %v1776_v10, %v1792_v25 }
 0x337   : > { %1770 = vst [vmem:[#allocation4 + $0x30] sm:$0xff] %v1762_v42  ;;  %v1803_v21 = vmax.f32 %v1772_v4, %v1788_v6  ;;  %v1782_v46 = vld [vmem:[#allocation4 + $0x28] ss:$2 sm:$0xf] }
 0x338   : > { %v1798_v47 = vld [vmem:[#allocation4 + $0x29] ss:$2 sm:$0xf]  ;;  %v1812_v52 = vmax.f32 %v1805_v11, %v1806_v55 }
 0x339   : > { %v1811_v3 = vmax.f32 %v1803_v21, %v1804_v45  ;;  %v1780_v22 = vld [vmem:[#allocation4 + $0x20] ss:$2 sm:$0xf]  ;;  %v1796_v34 = vld [vmem:[#allocation4 + $0x21] ss:$2 sm:$0xf]  ;;  %v1808_v16 = vmax.f32 %v1782_v46, %v1798_v47 }
 0x33a   : > { %1816 = vst [vmem:[%s224_s24 + $0x4] sm:$0xf] %v1812_v52  ;;  %v1807_v12 = vmax.f32 %v1780_v22, %v1796_v34 }
 0x33b   : > { %1815 = vst [vmem:[%s224_s24] sm:$0xf] %v1811_v3  ;;  %v1786_v48 = vld [vmem:[#allocation4 + $0x38] ss:$2 sm:$0xf] }
 0x33c   : > { %v1802_v57 = vld [vmem:[#allocation4 + $0x39] ss:$2 sm:$0xf]  ;;  %v1813_v26 = vmax.f32 %v1807_v12, %v1808_v16 }
 0x33d   : > { %v1810_v28 = vmax.f32 %v1786_v48, %v1802_v57 }
 0x33e   : > { %v1784_v27 = vld [vmem:[#allocation4 + $0x30] ss:$2 sm:$0xf]  ;;  %v1800_v53 = vld [vmem:[#allocation4 + $0x31] ss:$2 sm:$0xf] }
 0x33f   : > { %1817 = vst [vmem:[%s224_s24 + $0x8] sm:$0xf] %v1813_v26  ;;  %v1809_v29 = vmax.f32 %v1784_v27, %v1800_v53 }
 0x341   : > { %v1814_v14 = vmax.f32 %v1809_v29, %v1810_v28 }
 0x343   : > { %1818 = vst [vmem:[%s224_s24 + $0xc] sm:$0xf] %v1814_v14 }
 0x344 PF: > { %s15_s18 = sadd.s32 1, %s2345_s18  }
 0x345   : > { %p12_p4 = scmp.ge.s32.totalorder %s15_s18, 4  }
 0x347   :  { %14 = sbr.rel (!%p12_p4) target bundleno = 1 (0x1), region = 120 }

</bundles_post_ra>
